<compile_context>
chip_gen: v7x
topology: tpu7x:2x2x1
jax: 0.10.0
libtpu: 0.0.40
codegen_flags: <defaults>
</compile_context>

<pallas_src>
import functools

import jax
import jax.numpy as jnp
from jax.experimental import pallas as pl
from jax.experimental.pallas import tpu as pltpu

LANE = 128
VMEM_LIMIT = 64 * 1024 * 1024


def _round_up(x, m):
    return ((x + m - 1) // m) * m


def _choose_node_tiling(n):
    """Pad N to the smallest 128-multiple; pick the largest tile that divides it."""
    n_p = _round_up(max(n, 1), LANE)
    for t in (512, 256, 128):
        if n_p % t == 0:
            return n_p, t
    return n_p, LANE  # unreachable (n_p is always a 128-multiple)


# ----------------------------- kernels ------------------------------------- #

def transform_kernel(x_ref, w_ref, o_ref):
    """o = x @ w   (row-tiled dense feature transform, bf16 in / bf16 out)."""
    o_ref[...] = jnp.dot(
        x_ref[...], w_ref[...], preferred_element_type=jnp.float32
    ).astype(o_ref.dtype)


def agg_relu_proj_kernel(a_ref, b_ref, bias_ref, w_ref, o_ref, acc_ref):
    """o = relu(A @ B + bias) @ W ; K-tiled aggregation with f32 accumulator."""
    k = pl.program_id(1)

    @pl.when(k == 0)
    def _():
        acc_ref[...] = jnp.zeros_like(acc_ref)

    acc_ref[...] += jnp.dot(
        a_ref[...], b_ref[...], preferred_element_type=jnp.float32
    )

    @pl.when(k == pl.num_programs(1) - 1)
    def _():
        h = jnp.maximum(acc_ref[...] + bias_ref[...], 0.0)          # bias + ReLU (f32)
        o_ref[...] = jnp.dot(
            h.astype(w_ref.dtype), w_ref[...],
            preferred_element_type=jnp.float32,
        ).astype(o_ref.dtype)


def agg_logsoftmax_kernel(a_ref, b_ref, bias_ref, o_ref, acc_ref, *, num_valid):
    """o = log_softmax(A @ B + bias) over the first `num_valid` lanes."""
    k = pl.program_id(1)

    @pl.when(k == 0)
    def _():
        acc_ref[...] = jnp.zeros_like(acc_ref)

    acc_ref[...] += jnp.dot(
        a_ref[...], b_ref[...], preferred_element_type=jnp.float32
    )

    @pl.when(k == pl.num_programs(1) - 1)
    def _():
        logits = acc_ref[...] + bias_ref[...]
        col = jax.lax.broadcasted_iota(jnp.int32, logits.shape, 1)
        mask = col < num_valid
        z = jnp.where(mask, logits, -jnp.inf)      # mask lane padding
        m = jnp.max(z, axis=1, keepdims=True)
        s = z - m
        lse = jnp.log(jnp.sum(jnp.exp(s), axis=1, keepdims=True))
        o_ref[...] = jnp.where(mask, s - lse, 0.0)


# --------------------------- pallas_call wrappers --------------------------- #

def _tiled_transform(x, w, tm):
    n, f = x.shape
    d = w.shape[1]
    return pl.pallas_call(
        transform_kernel,
        out_shape=jax.ShapeDtypeStruct((n, d), jnp.bfloat16),
        grid=(n // tm,),
        in_specs=[
            pl.BlockSpec((tm, f), lambda i: (i, 0)),
            pl.BlockSpec((f, d), lambda i: (0, 0)),
        ],
        out_specs=pl.BlockSpec((tm, d), lambda i: (i, 0)),
        compiler_params=pltpu.CompilerParams(
            dimension_semantics=("parallel",),
            vmem_limit_bytes=VMEM_LIMIT,
        ),
        cost_estimate=pl.CostEstimate(
            flops=2 * n * f * d,
            transcendentals=0,
            bytes_accessed=x.size * x.dtype.itemsize
            + w.size * w.dtype.itemsize
            + n * d * 2,
        ),
    )(x, w)


def _tiled_agg_relu_proj(a, b, bias, w, tm, tk):
    n = a.shape[0]
    d_in = b.shape[1]
    d_out = w.shape[1]
    return pl.pallas_call(
        agg_relu_proj_kernel,
        out_shape=jax.ShapeDtypeStruct((n, d_out), jnp.bfloat16),
        grid=(n // tm, n // tk),
        in_specs=[
            pl.BlockSpec((tm, tk), lambda i, k: (i, k)),       # A_hat tile (bf16)
            pl.BlockSpec((tk, d_in), lambda i, k: (k, 0)),     # XW1 K-slab (bf16)
            pl.BlockSpec((1, d_in), lambda i, k: (0, 0)),      # b1 (resident)
            pl.BlockSpec((d_in, d_out), lambda i, k: (0, 0)),  # W2 (resident)
        ],
        out_specs=pl.BlockSpec((tm, d_out), lambda i, k: (i, 0)),
        scratch_shapes=[pltpu.VMEM((tm, d_in), jnp.float32)],
        compiler_params=pltpu.CompilerParams(
            dimension_semantics=("parallel", "arbitrary"),
            vmem_limit_bytes=VMEM_LIMIT,
        ),
        cost_estimate=pl.CostEstimate(
            flops=2 * n * n * d_in + 2 * n * d_in * d_out,
            transcendentals=0,
            bytes_accessed=a.size * a.dtype.itemsize
            + b.size * b.dtype.itemsize
            + w.size * w.dtype.itemsize
            + n * d_out * 2,
        ),
    )(a, b, bias, w)


def _tiled_agg_logsoftmax(a, b, bias, num_valid, tm, tk):
    n = a.shape[0]
    d = b.shape[1]
    kern = functools.partial(agg_logsoftmax_kernel, num_valid=num_valid)
    return pl.pallas_call(
        kern,
        out_shape=jax.ShapeDtypeStruct((n, d), jnp.float32),
        grid=(n // tm, n // tk),
        in_specs=[
            pl.BlockSpec((tm, tk), lambda i, k: (i, k)),   # A_hat tile (bf16)
            pl.BlockSpec((tk, d), lambda i, k: (k, 0)),    # H1W2 K-slab (bf16)
            pl.BlockSpec((1, d), lambda i, k: (0, 0)),     # b2 (resident)
        ],
        out_specs=pl.BlockSpec((tm, d), lambda i, k: (i, 0)),
        scratch_shapes=[pltpu.VMEM((tm, d), jnp.float32)],
        compiler_params=pltpu.CompilerParams(
            dimension_semantics=("parallel", "arbitrary"),
            vmem_limit_bytes=VMEM_LIMIT,
        ),
        cost_estimate=pl.CostEstimate(
            flops=2 * n * n * d,
            transcendentals=n * d,
            bytes_accessed=a.size * a.dtype.itemsize
            + b.size * b.dtype.itemsize
            + n * d * 4,
        ),
    )(a, b, bias)


# ------------------------------ forward pass -------------------------------- #

def _build_norm_adjacency(n, edge_index):
    """Dense A_hat = D^-1/2 (A + I) D^-1/2 (plain-JAX glue)."""
    src, dst = edge_index[0], edge_index[1]
    a = jnp.zeros((n, n), dtype=jnp.float32).at[dst, src].set(1.0)
    diag = jnp.arange(n)
    a = a.at[diag, diag].set(1.0)  # add self-loops (no double-count)
    deg = jnp.sum(a, axis=1)
    d_inv_sqrt = jnp.where(deg > 0, 1.0 / jnp.sqrt(deg), 0.0)
    return a * d_inv_sqrt[:, None] * d_inv_sqrt[None, :]


@jax.jit
def gcn_net_forward(x, edge_index, w1, b1, w2, b2):
    n, f = x.shape
    h = w1.shape[1]
    c = w2.shape[1]

    a_hat = _build_norm_adjacency(n, edge_index)

    # ---- pad to lane-dense / tile-aligned shapes (zero padding) ----
    n_p, tile = _choose_node_tiling(n)
    f_p = _round_up(f, LANE)
    h_p = _round_up(h, LANE)
    c_p = _round_up(c, LANE)
    tm = tk = tile

    a_p = jnp.zeros((n_p, n_p), jnp.bfloat16).at[:n, :n].set(
        a_hat.astype(jnp.bfloat16))
    x_p = jnp.zeros((n_p, f_p), jnp.bfloat16).at[:n, :f].set(
        x.astype(jnp.bfloat16))
    w1_p = jnp.zeros((f_p, h_p), jnp.bfloat16).at[:f, :h].set(
        w1.astype(jnp.bfloat16))
    b1_p = jnp.zeros((1, h_p), jnp.float32).at[:, :h].set(
        b1.reshape(1, h).astype(jnp.float32))
    w2_p = jnp.zeros((h_p, c_p), jnp.bfloat16).at[:h, :c].set(
        w2.astype(jnp.bfloat16))
    b2_p = jnp.zeros((1, c_p), jnp.float32).at[:, :c].set(
        b2.reshape(1, c).astype(jnp.float32))

    # layer 1 transform:      XW1  = X @ W1
    xw1 = _tiled_transform(x_p, w1_p, tm)                       # (n_p, h_p) bf16
    # layer 1 agg + layer 2 transform (fused finalize):
    #                         H1W2 = relu(A_hat @ XW1 + b1) @ W2
    h1w2 = _tiled_agg_relu_proj(a_p, xw1, b1_p, w2_p, tm, tk)   # (n_p, c_p) bf16
    # layer 2 agg + log_softmax: out = log_softmax(A_hat @ H1W2 + b2)
    out_p = _tiled_agg_logsoftmax(a_p, h1w2, b2_p, c, tm, tk)   # (n_p, c_p) f32

    return out_p[:n, :c]


def _reference_forward(x, edge_index, w1, b1, w2, b2):
    a_hat = _build_norm_adjacency(x.shape[0], edge_index)
    h1 = jnp.maximum(a_hat @ (x @ w1) + b1, 0.0)
    h2 = a_hat @ (h1 @ w2) + b2
    return jax.nn.log_softmax(h2, axis=1)


def _run_case(key, num_nodes, num_features, hidden, num_classes, num_edges):
    k_x, k_e, k_w1, k_w2 = jax.random.split(key, 4)

    x = jax.random.normal(k_x, (num_nodes, num_features), dtype=jnp.float32)
    edge_index = jax.random.randint(k_e, (2, num_edges), 0, num_nodes,
                                    dtype=jnp.int32)

    w1 = jax.random.normal(k_w1, (num_features, hidden), dtype=jnp.float32)
    w1 = w1 * jnp.sqrt(2.0 / (num_features + hidden))
    b1 = jnp.zeros((1, hidden), dtype=jnp.float32)
    w2 = jax.random.normal(k_w2, (hidden, num_classes), dtype=jnp.float32)
    w2 = w2 * jnp.sqrt(2.0 / (hidden + num_classes))
    b2 = jnp.zeros((1, num_classes), dtype=jnp.float32)

    out = gcn_net_forward(x, edge_index, w1, b1, w2, b2)
    jax.block_until_ready(out)

    ref = _reference_forward(x, edge_index, w1, b1, w2, b2)

    assert out.shape == (num_nodes, num_classes)
    # log_softmax rows must sum to 1 in prob space.
    probs_sum = jnp.sum(jnp.exp(out), axis=1)
    assert bool(jnp.all(jnp.abs(probs_sum - 1.0) < 1e-3))
    # bf16-tolerant match against the plain-JAX f32 reference.
    assert bool(jnp.max(jnp.abs(out - ref)) < 5e-2)


if __name__ == "__main__":
    # Shapes consistent with GCNNet: num_node_features=16, hidden=64, classes=4.
    key = jax.random.PRNGKey(0)
    k_small, k_med = jax.random.split(key, 2)

    # Tiny graph: single (128,128) tile, K-loop of length 1.
    _run_case(k_small, num_nodes=8, num_features=16, hidden=64,
              num_classes=4, num_edges=20)

    # Medium graph: pads to 384 nodes -> 128 tiles, (3,3) grid exercises the
    # f32-accumulator K-loop and the parallel row axis.
    _run_case(k_med, num_nodes=300, num_features=16, hidden=64,
              num_classes=4, num_edges=900)

    print("KERNEL_OK")
</pallas_src>

<mosaic_0001>
module attributes {stable_mosaic.version = 11 : i64} {
  func.func @transform_kernel(%arg0: i32, %arg1: memref<128x128xbf16, #tpu.memory_space<vmem>>, %arg2: memref<128x128xbf16, #tpu.memory_space<vmem>>, %arg3: memref<128x128xbf16, #tpu.memory_space<vmem>>) attributes {dimension_semantics = [#tpu.dimension_semantics<parallel>], iteration_bounds = array<i64: 1>, scalar_prefetch = 0 : i64, scratch_operands = 0 : i64, tpu.core_type = #tpu.core_type<tc>, window_params = [{transform_indices = @transform_0, window_bounds = array<i64: 128, 128>}, {pipeline_mode = #tpu.pipeline_mode<synchronous>, transform_indices = @transform_1, window_bounds = array<i64: 128, 128>}, {transform_indices = @transform_2, window_bounds = array<i64: 128, 128>}]} {
    %c0 = arith.constant 0 : index
    %c0_0 = arith.constant 0 : index
    %0 = vector.load %arg1[%c0, %c0_0] : memref<128x128xbf16, #tpu.memory_space<vmem>>, vector<128x128xbf16>
    %c0_1 = arith.constant 0 : index
    %c0_2 = arith.constant 0 : index
    %1 = vector.load %arg2[%c0_1, %c0_2] : memref<128x128xbf16, #tpu.memory_space<vmem>>, vector<128x128xbf16>
    %cst = arith.constant dense<0.000000e+00> : vector<128x128xf32>
    %2 = tpu.matmul %0, %1, %cst {dimension_numbers = #tpu.dot_dimension_numbers<[1], [0], [0], [1], [0, 0, 1, 1], [], []>} : vector<128x128xbf16>, vector<128x128xbf16>, vector<128x128xf32> -> vector<128x128xf32>
    %3 = arith.truncf %2 : vector<128x128xf32> to vector<128x128xbf16>
    %c0_3 = arith.constant 0 : index
    %c0_4 = arith.constant 0 : index
    %4 = vector.load %arg3[%c0_3, %c0_4] : memref<128x128xbf16, #tpu.memory_space<vmem>>, vector<128x128xbf16>
    tpu.vector_store %arg3[%c0_3, %c0_4], %3 {strides = array<i32>} : memref<128x128xbf16, #tpu.memory_space<vmem>>, vector<128x128xbf16>,
    return
  }
  func.func @transform_0(%arg0: i32) -> (i32, i32) {
    %c0_i32 = arith.constant 0 : i32
    %c0_i32_0 = arith.constant 0 : i32
    return %arg0, %c0_i32 : i32, i32
  }
  func.func @transform_1(%arg0: i32) -> (i32, i32) {
    %c0_i32 = arith.constant 0 : i32
    %c0_i32_0 = arith.constant 0 : i32
    %c0_i32_1 = arith.constant 0 : i32
    return %c0_i32, %c0_i32_0 : i32, i32
  }
  func.func @transform_2(%arg0: i32) -> (i32, i32) {
    %c0_i32 = arith.constant 0 : i32
    %c0_i32_0 = arith.constant 0 : i32
    return %arg0, %c0_i32 : i32, i32
  }
}

module attributes {stable_mosaic.version = 11 : i64} {
  func.func @agg_relu_proj_kernel(%arg0: i32, %arg1: i32, %arg2: memref<128x128xbf16, #tpu.memory_space<vmem>>, %arg3: memref<128x128xbf16, #tpu.memory_space<vmem>>, %arg4: memref<1x128xf32, #tpu.memory_space<vmem>>, %arg5: memref<128x128xbf16, #tpu.memory_space<vmem>>, %arg6: memref<128x128xbf16, #tpu.memory_space<vmem>>, %arg7: memref<128x128xf32, #tpu.memory_space<vmem>>) attributes {dimension_semantics = [#tpu.dimension_semantics<parallel>, #tpu.dimension_semantics<arbitrary>], iteration_bounds = array<i64: 1, 1>, scalar_prefetch = 0 : i64, scratch_operands = 1 : i64, tpu.core_type = #tpu.core_type<tc>, window_params = [{transform_indices = @transform_0, window_bounds = array<i64: 128, 128>}, {transform_indices = @transform_1, window_bounds = array<i64: 128, 128>}, {pipeline_mode = #tpu.pipeline_mode<synchronous>, transform_indices = @transform_2, window_bounds = array<i64: 1, 128>}, {pipeline_mode = #tpu.pipeline_mode<synchronous>, transform_indices = @transform_3, window_bounds = array<i64: 128, 128>}, {transform_indices = @transform_4, window_bounds = array<i64: 128, 128>}]} {
    %c0_i32 = arith.constant 0 : i32
    %0 = arith.cmpi eq, %arg1, %c0_i32 : i32
    %1 = arith.extui %0 : i1 to i32
    %c0_i32_0 = arith.constant 0 : i32
    %2 = arith.cmpi ne, %1, %c0_i32_0 : i32
    scf.if %2 {
      %cst_10 = arith.constant 0.000000e+00 : f32
      %12 = vector.broadcast %cst_10 : f32 to vector<128x128xf32>
      %c0_11 = arith.constant 0 : index
      %c0_12 = arith.constant 0 : index
      %13 = vector.load %arg7[%c0_11, %c0_12] : memref<128x128xf32, #tpu.memory_space<vmem>>, vector<128x128xf32>
      tpu.vector_store %arg7[%c0_11, %c0_12], %12 {strides = array<i32>} : memref<128x128xf32, #tpu.memory_space<vmem>>, vector<128x128xf32>,
    } else {
    }
    %c0 = arith.constant 0 : index
    %c0_1 = arith.constant 0 : index
    %3 = vector.load %arg7[%c0, %c0_1] : memref<128x128xf32, #tpu.memory_space<vmem>>, vector<128x128xf32>
    %c0_2 = arith.constant 0 : index
    %c0_3 = arith.constant 0 : index
    %4 = vector.load %arg2[%c0_2, %c0_3] : memref<128x128xbf16, #tpu.memory_space<vmem>>, vector<128x128xbf16>
    %c0_4 = arith.constant 0 : index
    %c0_5 = arith.constant 0 : index
    %5 = vector.load %arg3[%c0_4, %c0_5] : memref<128x128xbf16, #tpu.memory_space<vmem>>, vector<128x128xbf16>
    %cst = arith.constant dense<0.000000e+00> : vector<128x128xf32>
    %6 = tpu.matmul %4, %5, %cst {dimension_numbers = #tpu.dot_dimension_numbers<[1], [0], [0], [1], [0, 0, 1, 1], [], []>} : vector<128x128xbf16>, vector<128x128xbf16>, vector<128x128xf32> -> vector<128x128xf32>
    %7 = arith.addf %3, %6 : vector<128x128xf32>
    %c0_6 = arith.constant 0 : index
    %c0_7 = arith.constant 0 : index
    %8 = vector.load %arg7[%c0_6, %c0_7] : memref<128x128xf32, #tpu.memory_space<vmem>>, vector<128x128xf32>
    tpu.vector_store %arg7[%c0_6, %c0_7], %7 {strides = array<i32>} : memref<128x128xf32, #tpu.memory_space<vmem>>, vector<128x128xf32>,
    %c0_i32_8 = arith.constant 0 : i32
    %9 = arith.cmpi eq, %arg1, %c0_i32_8 : i32
    %10 = arith.extui %9 : i1 to i32
    %c0_i32_9 = arith.constant 0 : i32
    %11 = arith.cmpi ne, %10, %c0_i32_9 : i32
    scf.if %11 {
      %c0_10 = arith.constant 0 : index
      %c0_11 = arith.constant 0 : index
      %12 = vector.load %arg7[%c0_10, %c0_11] : memref<128x128xf32, #tpu.memory_space<vmem>>, vector<128x128xf32>
      %c0_12 = arith.constant 0 : index
      %c0_13 = arith.constant 0 : index
      %13 = vector.load %arg4[%c0_12, %c0_13] : memref<1x128xf32, #tpu.memory_space<vmem>>, vector<1x128xf32>
      %14 = vector.broadcast %13 : vector<1x128xf32> to vector<128x128xf32>
      %15 = arith.addf %12, %14 : vector<128x128xf32>
      %cst_14 = arith.constant 0.000000e+00 : f32
      %16 = vector.broadcast %cst_14 : f32 to vector<128x128xf32>
      %17 = arith.maximumf %15, %16 : vector<128x128xf32>
      %18 = arith.truncf %17 : vector<128x128xf32> to vector<128x128xbf16>
      %c0_15 = arith.constant 0 : index
      %c0_16 = arith.constant 0 : index
      %19 = vector.load %arg5[%c0_15, %c0_16] : memref<128x128xbf16, #tpu.memory_space<vmem>>, vector<128x128xbf16>
      %cst_17 = arith.constant dense<0.000000e+00> : vector<128x128xf32>
      %20 = tpu.matmul %18, %19, %cst_17 {dimension_numbers = #tpu.dot_dimension_numbers<[1], [0], [0], [1], [0, 0, 1, 1], [], []>} : vector<128x128xbf16>, vector<128x128xbf16>, vector<128x128xf32> -> vector<128x128xf32>
      %21 = arith.truncf %20 : vector<128x128xf32> to vector<128x128xbf16>
      %c0_18 = arith.constant 0 : index
      %c0_19 = arith.constant 0 : index
      %22 = vector.load %arg6[%c0_18, %c0_19] : memref<128x128xbf16, #tpu.memory_space<vmem>>, vector<128x128xbf16>
      tpu.vector_store %arg6[%c0_18, %c0_19], %21 {strides = array<i32>} : memref<128x128xbf16, #tpu.memory_space<vmem>>, vector<128x128xbf16>,
    } else {
    }
    return
  }
  func.func @transform_0(%arg0: i32, %arg1: i32) -> (i32, i32) {
    %c0_i32 = arith.constant 0 : i32
    return %arg0, %arg1 : i32, i32
  }
  func.func @transform_1(%arg0: i32, %arg1: i32) -> (i32, i32) {
    %c0_i32 = arith.constant 0 : i32
    %c0_i32_0 = arith.constant 0 : i32
    return %arg1, %c0_i32 : i32, i32
  }
  func.func @transform_2(%arg0: i32, %arg1: i32) -> (i32, i32) {
    %c0_i32 = arith.constant 0 : i32
    %c0_i32_0 = arith.constant 0 : i32
    %c0_i32_1 = arith.constant 0 : i32
    return %c0_i32, %c0_i32_0 : i32, i32
  }
  func.func @transform_3(%arg0: i32, %arg1: i32) -> (i32, i32) {
    %c0_i32 = arith.constant 0 : i32
    %c0_i32_0 = arith.constant 0 : i32
    %c0_i32_1 = arith.constant 0 : i32
    return %c0_i32, %c0_i32_0 : i32, i32
  }
  func.func @transform_4(%arg0: i32, %arg1: i32) -> (i32, i32) {
    %c0_i32 = arith.constant 0 : i32
    %c0_i32_0 = arith.constant 0 : i32
    return %arg0, %c0_i32 : i32, i32
  }
}

module attributes {stable_mosaic.version = 11 : i64} {
  func.func @agg_logsoftmax_kernel(%arg0: i32, %arg1: i32, %arg2: memref<128x128xbf16, #tpu.memory_space<vmem>>, %arg3: memref<128x128xbf16, #tpu.memory_space<vmem>>, %arg4: memref<1x128xf32, #tpu.memory_space<vmem>>, %arg5: memref<128x128xf32, #tpu.memory_space<vmem>>, %arg6: memref<128x128xf32, #tpu.memory_space<vmem>>) attributes {dimension_semantics = [#tpu.dimension_semantics<parallel>, #tpu.dimension_semantics<arbitrary>], iteration_bounds = array<i64: 1, 1>, scalar_prefetch = 0 : i64, scratch_operands = 1 : i64, tpu.core_type = #tpu.core_type<tc>, window_params = [{transform_indices = @transform_0, window_bounds = array<i64: 128, 128>}, {transform_indices = @transform_1, window_bounds = array<i64: 128, 128>}, {pipeline_mode = #tpu.pipeline_mode<synchronous>, transform_indices = @transform_2, window_bounds = array<i64: 1, 128>}, {transform_indices = @transform_3, window_bounds = array<i64: 128, 128>}]} {
    %c0_i32 = arith.constant 0 : i32
    %0 = arith.cmpi eq, %arg1, %c0_i32 : i32
    %1 = arith.extui %0 : i1 to i32
    %c0_i32_0 = arith.constant 0 : i32
    %2 = arith.cmpi ne, %1, %c0_i32_0 : i32
    scf.if %2 {
      %cst_10 = arith.constant 0.000000e+00 : f32
      %12 = vector.broadcast %cst_10 : f32 to vector<128x128xf32>
      %c0_11 = arith.constant 0 : index
      %c0_12 = arith.constant 0 : index
      %13 = vector.load %arg6[%c0_11, %c0_12] : memref<128x128xf32, #tpu.memory_space<vmem>>, vector<128x128xf32>
      tpu.vector_store %arg6[%c0_11, %c0_12], %12 {strides = array<i32>} : memref<128x128xf32, #tpu.memory_space<vmem>>, vector<128x128xf32>,
    } else {
    }
    %c0 = arith.constant 0 : index
    %c0_1 = arith.constant 0 : index
    %3 = vector.load %arg6[%c0, %c0_1] : memref<128x128xf32, #tpu.memory_space<vmem>>, vector<128x128xf32>
    %c0_2 = arith.constant 0 : index
    %c0_3 = arith.constant 0 : index
    %4 = vector.load %arg2[%c0_2, %c0_3] : memref<128x128xbf16, #tpu.memory_space<vmem>>, vector<128x128xbf16>
    %c0_4 = arith.constant 0 : index
    %c0_5 = arith.constant 0 : index
    %5 = vector.load %arg3[%c0_4, %c0_5] : memref<128x128xbf16, #tpu.memory_space<vmem>>, vector<128x128xbf16>
    %cst = arith.constant dense<0.000000e+00> : vector<128x128xf32>
    %6 = tpu.matmul %4, %5, %cst {dimension_numbers = #tpu.dot_dimension_numbers<[1], [0], [0], [1], [0, 0, 1, 1], [], []>} : vector<128x128xbf16>, vector<128x128xbf16>, vector<128x128xf32> -> vector<128x128xf32>
    %7 = arith.addf %3, %6 : vector<128x128xf32>
    %c0_6 = arith.constant 0 : index
    %c0_7 = arith.constant 0 : index
    %8 = vector.load %arg6[%c0_6, %c0_7] : memref<128x128xf32, #tpu.memory_space<vmem>>, vector<128x128xf32>
    tpu.vector_store %arg6[%c0_6, %c0_7], %7 {strides = array<i32>} : memref<128x128xf32, #tpu.memory_space<vmem>>, vector<128x128xf32>,
    %c0_i32_8 = arith.constant 0 : i32
    %9 = arith.cmpi eq, %arg1, %c0_i32_8 : i32
    %10 = arith.extui %9 : i1 to i32
    %c0_i32_9 = arith.constant 0 : i32
    %11 = arith.cmpi ne, %10, %c0_i32_9 : i32
    scf.if %11 {
      %c0_10 = arith.constant 0 : index
      %c0_11 = arith.constant 0 : index
      %12 = vector.load %arg6[%c0_10, %c0_11] : memref<128x128xf32, #tpu.memory_space<vmem>>, vector<128x128xf32>
      %c0_12 = arith.constant 0 : index
      %c0_13 = arith.constant 0 : index
      %13 = vector.load %arg4[%c0_12, %c0_13] : memref<1x128xf32, #tpu.memory_space<vmem>>, vector<1x128xf32>
      %14 = vector.broadcast %13 : vector<1x128xf32> to vector<128x128xf32>
      %15 = arith.addf %12, %14 : vector<128x128xf32>
      %16 = tpu.iota {dimensions = array<i32: 1>} : vector<128x128xi32>
      %c4_i32 = arith.constant 4 : i32
      %17 = vector.broadcast %c4_i32 : i32 to vector<128x128xi32>
      %18 = arith.cmpi slt, %16, %17 : vector<128x128xi32>
      %cst_14 = arith.constant 0xFF800000 : f32
      %19 = vector.broadcast %cst_14 : f32 to vector<128x128xf32>
      %20 = arith.select %18, %15, %19 : vector<128x128xi1>, vector<128x128xf32>
      %cst_15 = arith.constant dense<0xFF800000> : vector<128xf32>
      %21 = vector.multi_reduction <maximumf>, %20, %cst_15 [1] : vector<128x128xf32> to vector<128xf32>
      %22 = vector.shape_cast %21 : vector<128xf32> to vector<128x1xf32>
      %23 = vector.broadcast %22 : vector<128x1xf32> to vector<128x128xf32>
      %24 = arith.subf %20, %23 : vector<128x128xf32>
      %25 = math.exp %24 : vector<128x128xf32>
      %cst_16 = arith.constant dense<0.000000e+00> : vector<128xf32>
      %26 = vector.multi_reduction <add>, %25, %cst_16 [1] : vector<128x128xf32> to vector<128xf32>
      %27 = vector.shape_cast %26 : vector<128xf32> to vector<128x1xf32>
      %28 = math.log %27 : vector<128x1xf32>
      %29 = vector.broadcast %28 : vector<128x1xf32> to vector<128x128xf32>
      %30 = arith.subf %24, %29 : vector<128x128xf32>
      %cst_17 = arith.constant 0.000000e+00 : f32
      %31 = vector.broadcast %cst_17 : f32 to vector<128x128xf32>
      %32 = arith.select %18, %30, %31 : vector<128x128xi1>, vector<128x128xf32>
      %c0_18 = arith.constant 0 : index
      %c0_19 = arith.constant 0 : index
      %33 = vector.load %arg5[%c0_18, %c0_19] : memref<128x128xf32, #tpu.memory_space<vmem>>, vector<128x128xf32>
      tpu.vector_store %arg5[%c0_18, %c0_19], %32 {strides = array<i32>} : memref<128x128xf32, #tpu.memory_space<vmem>>, vector<128x128xf32>,
    } else {
    }
    return
  }
  func.func @transform_0(%arg0: i32, %arg1: i32) -> (i32, i32) {
    %c0_i32 = arith.constant 0 : i32
    return %arg0, %arg1 : i32, i32
  }
  func.func @transform_1(%arg0: i32, %arg1: i32) -> (i32, i32) {
    %c0_i32 = arith.constant 0 : i32
    %c0_i32_0 = arith.constant 0 : i32
    return %arg1, %c0_i32 : i32, i32
  }
  func.func @transform_2(%arg0: i32, %arg1: i32) -> (i32, i32) {
    %c0_i32 = arith.constant 0 : i32
    %c0_i32_0 = arith.constant 0 : i32
    %c0_i32_1 = arith.constant 0 : i32
    return %c0_i32, %c0_i32_0 : i32, i32
  }
  func.func @transform_3(%arg0: i32, %arg1: i32) -> (i32, i32) {
    %c0_i32 = arith.constant 0 : i32
    %c0_i32_0 = arith.constant 0 : i32
    return %arg0, %c0_i32 : i32, i32
  }
}

</mosaic_0001>

<bundles_post_ra>
// kernel: gcn_net_forward.3
= control target key start
LH: loop header
LB: loop body
LE: loop exit
PB: predicated region body
PF: predicated region fallthrough
CT: control target
= control target key end

     0   :  { %7 = vsyncpa [#allocation3], 0  ;;  %s681_s0 = inlined_call_operand.hbm [shape: bf16[128,128], index: 0, kind: input, shape index: {}]   ;;  %s682_s1 = inlined_call_operand.hbm [shape: bf16[128,128], index: 1, kind: input, shape index: {}]   ;;  %s683_s2 = inlined_call_operand.hbm [shape: bf16[128,128], index: 2, kind: output, shape index: {}]  }
   0x1   :  { %8 = vsyncpa [#allocation6], 0 }
   0x2   :  { %9 = vsyncpa [#allocation4], 0  ;;  %s616_s9 = smov [#allocation2]   ;;  %s544_s13 = scalar_lea.hbm %s681_s0, 1024 }
   0x3   :  { %s15_s10 = sshll.u32 %s616_s9, 4  ;;  %p545_p0 = scmp.ne.s32.totalorder %s681_s0, %s544_s13  ;;  %s16_s10 = int_to_ptr.vmem [resolvable:$true] %s15_s10 }
   0x4   :  { %p548_p1 = scmp.lt.u32.totalorder %s544_s13, %s681_s0 }
   0x6   :  { %p550_p2 = pnand %p548_p1, %p545_p0 }
   0x8   :  { %553 = shalt.err (!%p550_p2)
}
   0x9   :  { %s554_s18 = scalar_lea.vmem %s16_s10, 1024  ;;  %p559_p4 = scmp.lt.s32.totalorder %s16_s10, %s16_s10 }
   0xa   :  { %p555_p3 = scmp.ne.s32.totalorder %s16_s10, %s554_s18  ;;  %p560_p5 = scmp.lt.s32.totalorder %s554_s18, %s554_s18 }
   0xc   :  { %p561_p6 = por %p560_p5, %p559_p4 }
   0xe   :  { %p562_p7 = pnand %p561_p6, %p555_p3 }
  0x10   :  { %565 = shalt.err (!%p562_p7)
}
  0x11   :  { %s617_s19 = smov 64   ;;  %s618_s20 = smov 4  }
  0x12   :  { %21 = dma.hbm_to_vmem [thread:$0]  %s681_s0, 1024, %s16_s10, [#allocation3], %s617_s19, %s617_s19, %s618_s20  }
  0x13   :  { %s619_s23 = smov [#allocation5]   ;;  %s566_s27 = scalar_lea.hbm %s682_s1, 1024 }
  0x14   :  { %s27_s24 = sshll.u32 %s619_s23, 4  ;;  %p567_p8 = scmp.ne.s32.totalorder %s682_s1, %s566_s27  ;;  %s28_s24 = int_to_ptr.vmem [resolvable:$true] %s27_s24 }
  0x15   :  { %p570_p9 = scmp.lt.u32.totalorder %s566_s27, %s682_s1 }
  0x17   :  { %p572_p10 = pnand %p570_p9, %p567_p8 }
  0x19   :  { %575 = shalt.err (!%p572_p10)
}
  0x1a   :  { %s576_s4 = scalar_lea.vmem %s28_s24, 1024  ;;  %p581_p12 = scmp.lt.s32.totalorder %s28_s24, %s28_s24 }
  0x1b   :  { %p577_p11 = scmp.ne.s32.totalorder %s28_s24, %s576_s4  ;;  %p582_p13 = scmp.lt.s32.totalorder %s576_s4, %s576_s4 }
  0x1d   :  { %p583_p0 = por %p582_p13, %p581_p12 }
  0x1f   :  { %p584_p1 = pnand %p583_p0, %p577_p11 }
  0x21   :  { %587 = shalt.err (!%p584_p1)
}
  0x22   :  { %33 = dma.hbm_to_vmem [thread:$0]  %s682_s1, 1024, %s28_s24, [#allocation6], %s617_s19, %s617_s19, %s618_s20  }
  0x23   :  { %610 = dma.done.wait [#allocation3], 1024  }
  0x24   :  { %611 = vsyncadd [#allocation3], 4294966272 }
  0x25   :  { %612 = dma.done.wait [#allocation6], 1024  }
  0x26   :  { %613 = vsyncadd [#allocation6], 4294966272  ;;  %v528_v0 = vld [vmem:[#allocation5] sm:$0xff]   ;;  %v529_v1 = vld [vmem:[#allocation5 + $0x8] sm:$0xff]   ;;  %s620_s1 = smov [#allocation7]  }
  0x27   :  { %475 = vmatprep.subr.bf16.mxu0 %v528_v0  ;;  %507 = vmatprep.subr.bf16.mxu1 %v528_v0  ;;  %v530_v2 = vld [vmem:[#allocation5 + $0x10] sm:$0xff]   ;;  %v531_v3 = vld [vmem:[#allocation5 + $0x18] sm:$0xff]   ;;  %v536_v4 = vld [vmem:[#allocation2] sm:$0xff]   ;;  %s351_s6 = sshll.u32 %s620_s1, 4  ;;  %s352_s6 = int_to_ptr.vmem [resolvable:$true] %s351_s6 }
  0x28   :  { %476 = vmatpush3.bf16.msra.mxu0 %v528_v0  ;;  %515 = vmatpush3.bf16.msra.mxu1 %v528_v0  ;;  %v537_v5 = vld [vmem:[#allocation2 + $0x20] sm:$0xff]   ;;  %v533_v7 = vld [vmem:[#allocation5 + $0x28] sm:$0xff]   ;;  %v534_v8 = vld [vmem:[#allocation5 + $0x30] sm:$0xff]   ;;  %s588_s7 = scalar_lea.vmem %s352_s6, 1024  ;;  %p593_p3 = scmp.lt.s32.totalorder %s352_s6, %s352_s6 }
  0x29   :  { %477 = vmatprep.subr.bf16.mxu0 %v529_v1  ;;  %508 = vmatprep.subr.bf16.mxu1 %v529_v1  ;;  %v532_v6 = vld [vmem:[#allocation5 + $0x20] sm:$0xff]   ;;  %v535_v9 = vld [vmem:[#allocation5 + $0x38] sm:$0xff]   ;;  %v538_v10 = vld [vmem:[#allocation2 + $0x8] sm:$0xff]   ;;  %p589_p2 = scmp.ne.s32.totalorder %s352_s6, %s588_s7  ;;  %p594_p4 = scmp.lt.s32.totalorder %s588_s7, %s588_s7 }
  0x2a   :  { %491 = vmatprep.mubr.bf16.mxu0 %v536_v4  ;;  %499 = vmatprep.mubr.bf16.mxu1 %v537_v5  ;;  %v539_v11 = vld [vmem:[#allocation2 + $0x28] sm:$0xff]   ;;  %v540_v12 = vld [vmem:[#allocation2 + $0x10] sm:$0xff]   ;;  %v542_v14 = vld [vmem:[#allocation2 + $0x18] sm:$0xff]  }
  0x2b   :  { %v541_v13 = vld [vmem:[#allocation2 + $0x30] sm:$0xff]   ;;  %v543_v15 = vld [vmem:[#allocation2 + $0x38] sm:$0xff]   ;;  %p595_p5 = por %p594_p4, %p593_p3 }
  0x2c   :  { %478 = vmatpush3.bf16.msra.mxu0 %v529_v1  ;;  %516 = vmatpush3.bf16.msra.mxu1 %v529_v1 }
  0x2d   :  { %479 = vmatprep.subr.bf16.mxu0 %v530_v2  ;;  %509 = vmatprep.subr.bf16.mxu1 %v530_v2  ;;  %p596_p6 = pnand %p595_p5, %p589_p2 }
  0x30   :  { %480 = vmatpush3.bf16.msra.mxu0 %v530_v2  ;;  %517 = vmatpush3.bf16.msra.mxu1 %v530_v2 }
  0x31   :  { %481 = vmatprep.subr.bf16.mxu0 %v531_v3  ;;  %510 = vmatprep.subr.bf16.mxu1 %v531_v3 }
  0x34   :  { %482 = vmatpush3.bf16.msra.mxu0 %v531_v3  ;;  %518 = vmatpush3.bf16.msra.mxu1 %v531_v3 }
  0x35   :  { %483 = vmatprep.subr.bf16.mxu0 %v532_v6  ;;  %511 = vmatprep.subr.bf16.mxu1 %v532_v6 }
  0x38   :  { %484 = vmatpush3.bf16.msra.mxu0 %v532_v6  ;;  %519 = vmatpush3.bf16.msra.mxu1 %v532_v6 }
  0x39   :  { %485 = vmatprep.subr.bf16.mxu0 %v533_v7  ;;  %512 = vmatprep.subr.bf16.mxu1 %v533_v7 }
  0x3c   :  { %486 = vmatpush3.bf16.msra.mxu0 %v533_v7  ;;  %520 = vmatpush3.bf16.msra.mxu1 %v533_v7 }
  0x3d   :  { %487 = vmatprep.subr.bf16.mxu0 %v534_v8  ;;  %513 = vmatprep.subr.bf16.mxu1 %v534_v8 }
  0x40   :  { %488 = vmatpush3.bf16.msra.mxu0 %v534_v8  ;;  %521 = vmatpush3.bf16.msra.mxu1 %v534_v8 }
  0x41   :  { %489 = vmatprep.subr.bf16.mxu0 %v535_v9  ;;  %514 = vmatprep.subr.bf16.mxu1 %v535_v9 }
  0x44   :  { %490 = vmatpush3.bf16.msra.mxu0 %v535_v9  ;;  %522 = vmatpush3.bf16.msra.mxu1 %v535_v9 }
  0x47   :  { %492 = vmatmul.mubr.bf16.vlgmr.msra.gmra.mrb[0].mxu0 %v538_v10  ;;  %500 = vmatmul.mubr.bf16.vlgmr.msra.gmra.mrb[0].mxu1 %v539_v11 }
  0x48   :  { %495 = vmatprep.mubr.bf16.mxu0 %v540_v12  ;;  %503 = vmatprep.mubr.bf16.mxu1 %v541_v13 }
  0x4f   :  { %496 = vmatmul.mubr.bf16.gmra.mrb[4].mxu0 %v542_v14  ;;  %504 = vmatmul.mubr.bf16.gmra.mrb[4].mxu1 %v543_v15 }
 0x11a   :  { %v493_v16 = vpop.f32.mrb[0].mxu0  ;;  %v501_v17 = vpop.f32.mrb[0].mxu1 }
 0x11b   :  { %v203_v18 = vpop.f32.mrb[1].mxu0  ;;  %v235_v19 = vpop.f32.mrb[1].mxu1 }
 0x11c   :  { %v494_v20 = vpop.f32.mrb[2].mxu0  ;;  %v502_v21 = vpop.f32.mrb[2].mxu1 }
 0x11d   :  { %v420_v22 = vpack.c.bf16 %v494_v20, %v493_v16  ;;  %v440_v23 = vpack.c.bf16 %v502_v21, %v501_v17  ;;  %v206_v24 = vpop.f32.mrb[3].mxu0  ;;  %v238_v25 = vpop.f32.mrb[3].mxu1 }
 0x11e   :  { %v415_v26 = vpack.c.bf16 %v206_v24, %v203_v18  ;;  %v435_v27 = vpack.c.bf16 %v238_v25, %v235_v19 }
 0x11f   :  { %452 = vst [vmem:[#allocation7 + $0x8] sm:$0xff] %v420_v22   ;;  %456 = vst [vmem:[#allocation7 + $0x28] sm:$0xff] %v440_v23  }
 0x120   :  { %416 = vst [vmem:[#allocation7] sm:$0xff] %v415_v26   ;;  %455 = vst [vmem:[#allocation7 + $0x20] sm:$0xff] %v435_v27  }
 0x122   :  { %v497_v28 = vpop.f32.mrb[4].mxu0  ;;  %v505_v29 = vpop.f32.mrb[4].mxu1 }
 0x123   :  { %v219_v30 = vpop.f32.mrb[5].mxu0  ;;  %v251_v31 = vpop.f32.mrb[5].mxu1 }
 0x124   :  { %v498_v32 = vpop.f32.mrb[6].mxu0  ;;  %v506_v33 = vpop.f32.mrb[6].mxu1 }
 0x125   :  { %v430_v34 = vpack.c.bf16 %v498_v32, %v497_v28  ;;  %v450_v35 = vpack.c.bf16 %v506_v33, %v505_v29  ;;  %v222_v36 = vpop.f32.mrb[7].mxu0  ;;  %v254_v37 = vpop.f32.mrb[7].mxu1 }
 0x126   :  { %v425_v38 = vpack.c.bf16 %v222_v36, %v219_v30  ;;  %v445_v39 = vpack.c.bf16 %v254_v37, %v251_v31 }
 0x127   :  { %454 = vst [vmem:[#allocation7 + $0x18] sm:$0xff] %v430_v34   ;;  %458 = vst [vmem:[#allocation7 + $0x38] sm:$0xff] %v450_v35  }
 0x128   :  { %453 = vst [vmem:[#allocation7 + $0x10] sm:$0xff] %v425_v38   ;;  %457 = vst [vmem:[#allocation7 + $0x30] sm:$0xff] %v445_v39  }
 0x129   :  { %599 = shalt.err (!%p596_p6)
}
 0x12a   :  { %s600_s10 = scalar_lea.hbm %s683_s2, 1024 }
 0x12b   :  { %p601_p7 = scmp.ne.s32.totalorder %s683_s2, %s600_s10  ;;  %p604_p8 = scmp.lt.u32.totalorder %s600_s10, %s683_s2 }
 0x12d   :  { %p606_p9 = pnand %p604_p8, %p601_p7 }
 0x12f   :  { %609 = shalt.err (!%p606_p9)
}
 0x130   :  { %357 = dma.vmem_to_hbm [thread:$0]  %s352_s6, 1024, %s683_s2, [#allocation4], %s617_s19, %s617_s19, %s618_s20  }
 0x131   :  { %614 = dma.done.wait [#allocation4], 1024  }
 0x132   :  { %615 = vsyncadd [#allocation4], 4294966272 }
 0x133   :  { %361 = vsyncpa [#allocation3], 1 }
 0x134   :  { %362 = vsyncpa [#allocation6], 1 }
 0x135   :  { %363 = vsyncpa [#allocation4], 1 }

// kernel: gcn_net_forward.4
= control target key start
LH: loop header
LB: loop body
LE: loop exit
PB: predicated region body
PF: predicated region fallthrough
CT: control target
= control target key end

     0   :  { %9 = vsyncpa [#allocation4], 0  ;;  %s1158_s0 = inlined_call_operand.hbm [shape: bf16[128,128], index: 0, kind: input, shape index: {}]   ;;  %s1159_s1 = inlined_call_operand.hbm [shape: bf16[128,128], index: 1, kind: input, shape index: {}]   ;;  %s1160_s2 = inlined_call_operand.hbm [shape: f32[1,128], index: 2, kind: input, shape index: {}]   ;;  %s1161_s3 = inlined_call_operand.hbm [shape: bf16[128,128], index: 3, kind: input, shape index: {}]   ;;  %s1162_s4 = inlined_call_operand.hbm [shape: bf16[128,128], index: 4, kind: output, shape index: {}]  }
   0x1   :  { %10 = vsyncpa [#allocation7], 0 }
   0x2   :  { %11 = vsyncpa [#allocation10], 0 }
   0x3   :  { %12 = vsyncpa [#allocation5], 0  ;;  %s1040_s15 = smov [#allocation6]   ;;  %s1041_s17 = smov [#allocation3]  }
   0x4   :  { %s30_s16 = sshll.u32 %s1040_s15, 4  ;;  %s18_s18 = sshll.u32 %s1041_s17, 4  ;;  %s31_s16 = int_to_ptr.vmem [resolvable:$true] %s30_s16  ;;  %s1072_s18 = int_to_ptr.vmem [resolvable:$true] %s18_s18 }
   0x5   :  { %s922_s21 = scalar_lea.hbm %s1159_s1, 1024 }
   0x6   :  { %p923_p0 = scmp.ne.s32.totalorder %s1159_s1, %s922_s21  ;;  %p926_p1 = scmp.lt.u32.totalorder %s922_s21, %s1159_s1 }
   0x8   :  { %p928_p2 = pnand %p926_p1, %p923_p0 }
   0xa   :  { %931 = shalt.err (!%p928_p2)
}
   0xb   :  { %s932_s26 = scalar_lea.vmem %s31_s16, 1024  ;;  %p937_p4 = scmp.lt.s32.totalorder %s31_s16, %s31_s16 }
   0xc   :  { %p933_p3 = scmp.ne.s32.totalorder %s31_s16, %s932_s26  ;;  %p938_p5 = scmp.lt.s32.totalorder %s932_s26, %s932_s26 }
   0xe   :  { %p939_p6 = por %p938_p5, %p937_p4 }
  0x10   :  { %p940_p7 = pnand %p939_p6, %p933_p3 }
  0x12   :  { %943 = shalt.err (!%p940_p7)
}
  0x13   :  { %s1042_s27 = smov 64   ;;  %s1043_s28 = smov 4  }
  0x14   :  { %36 = dma.hbm_to_vmem [thread:$0]  %s1159_s1, 1024, %s31_s16, [#allocation7], %s1042_s27, %s1042_s27, %s1043_s28  }
  0x15   :  { %s944_s7 = scalar_lea.hbm %s1158_s0, 1024 }
  0x16   :  { %p945_p8 = scmp.ne.s32.totalorder %s1158_s0, %s944_s7  ;;  %p948_p9 = scmp.lt.u32.totalorder %s944_s7, %s1158_s0 }
  0x18   :  { %p950_p10 = pnand %p948_p9, %p945_p8 }
  0x1a   :  { %953 = shalt.err (!%p950_p10)
}
  0x1b   :  { %s954_s12 = scalar_lea.vmem %s1072_s18, 1024  ;;  %p959_p12 = scmp.lt.s32.totalorder %s1072_s18, %s1072_s18 }
  0x1c   :  { %p955_p11 = scmp.ne.s32.totalorder %s1072_s18, %s954_s12  ;;  %p960_p13 = scmp.lt.s32.totalorder %s954_s12, %s954_s12 }
  0x1e   :  { %p961_p0 = por %p960_p13, %p959_p12 }
  0x20   :  { %p962_p1 = pnand %p961_p0, %p955_p11 }
  0x22   :  { %965 = shalt.err (!%p962_p1)
}
  0x23   :  { %24 = dma.hbm_to_vmem [thread:$0]  %s1158_s0, 1024, %s1072_s18, [#allocation4], %s1042_s27, %s1042_s27, %s1043_s28  }
  0x24   :  { %s1044_s14 = smov [#allocation8]   ;;  %s1045_s16 = smov [#allocation9]  }
  0x25   :  { %s43_s15 = sshll.u32 %s1044_s14, 4  ;;  %s52_s17 = sshll.u32 %s1045_s16, 4  ;;  %s44_s15 = int_to_ptr.vmem [resolvable:$true] %s43_s15  ;;  %s1109_s17 = int_to_ptr.vmem [resolvable:$true] %s52_s17 }
  0x26   :  { %s966_s21 = scalar_lea.hbm %s1160_s2, 16 }
  0x27   :  { %p967_p2 = scmp.ne.s32.totalorder %s1160_s2, %s966_s21  ;;  %p970_p3 = scmp.lt.u32.totalorder %s966_s21, %s1160_s2 }
  0x29   :  { %p972_p4 = pnand %p970_p3, %p967_p2 }
  0x2b   :  { %975 = shalt.err (!%p972_p4)
}
  0x2c   :  { %s976_s0 = scalar_lea.vmem %s44_s15, 16  ;;  %s980_s18 = scalar_lea.vmem %s44_s15, 32 }
  0x2d   :  { %p977_p5 = scmp.ne.s32.totalorder %s44_s15, %s976_s0  ;;  %p981_p6 = scmp.lt.s32.totalorder %s44_s15, %s44_s15 }
  0x2e   :  { %p982_p7 = scmp.lt.s32.totalorder %s980_s18, %s976_s0 }
  0x30   :  { %p983_p8 = por %p982_p7, %p981_p6 }
  0x32   :  { %p984_p9 = pnand %p983_p8, %p977_p5 }
  0x34   :  { %987 = shalt.err (!%p984_p9)
}
  0x35   :  { %46 = dma.hbm_to_vmem [thread:$0]  %s1160_s2, 16, %s44_s15, [#allocation7]  }
  0x36   :  { %s988_s6 = scalar_lea.hbm %s1161_s3, 1024 }
  0x37   :  { %p989_p10 = scmp.ne.s32.totalorder %s1161_s3, %s988_s6  ;;  %p992_p11 = scmp.lt.u32.totalorder %s988_s6, %s1161_s3 }
  0x39   :  { %p994_p12 = pnand %p992_p11, %p989_p10 }
  0x3b   :  { %997 = shalt.err (!%p994_p12)
}
  0x3c   :  { %s998_s11 = scalar_lea.vmem %s1109_s17, 1024  ;;  %p1003_p0 = scmp.lt.s32.totalorder %s1109_s17, %s1109_s17 }
  0x3d   :  { %p999_p13 = scmp.ne.s32.totalorder %s1109_s17, %s998_s11  ;;  %p1004_p1 = scmp.lt.s32.totalorder %s998_s11, %s998_s11 }
  0x3f   :  { %p1005_p2 = por %p1004_p1, %p1003_p0 }
  0x41   :  { %p1006_p3 = pnand %p1005_p2, %p999_p13 }
  0x43   :  { %1009 = shalt.err (!%p1006_p3)
}
  0x44   :  { %58 = dma.hbm_to_vmem [thread:$0]  %s1161_s3, 1024, %s1109_s17, [#allocation10], %s1042_s27, %s1042_s27, %s1043_s28  }
  0x45   :  { %1032 = dma.done.wait [#allocation4], 1024  }
  0x46   :  { %1033 = vsyncadd [#allocation4], 4294966272 }
  0x47   :  { %1034 = dma.done.wait [#allocation7], 1040  }
  0x48   :  { %1035 = vsyncadd [#allocation7], 4294966256 }
  0x49   :  { %1036 = dma.done.wait [#allocation10], 1024  }
  0x4a   :  { %1037 = vsyncadd [#allocation10], 4294966272  ;;  %v898_v0 = vld [vmem:[#allocation6] sm:$0xff]   ;;  %v899_v1 = vld [vmem:[#allocation6 + $0x8] sm:$0xff]   ;;  %s1046_s3 = smov [#allocation11]  }
  0x4b   :  { %827 = vmatprep.subr.bf16.mxu0 %v898_v0  ;;  %v900_v2 = vld [vmem:[#allocation6 + $0x10] sm:$0xff]   ;;  %v901_v3 = vld [vmem:[#allocation6 + $0x18] sm:$0xff]   ;;  %v906_v4 = vld [vmem:[#allocation3] sm:$0xff]   ;;  %s677_s1 = sshll.u32 %s1046_s3, 4  ;;  %s678_s1 = int_to_ptr.vmem [resolvable:$true] %s677_s1 }
  0x4c   :  { %828 = vmatpush3.bf16.msra.mxu0 %v898_v0  ;;  %843 = vmatprep.mubr.bf16.mxu0 %v906_v4  ;;  %v902_v5 = vld [vmem:[#allocation6 + $0x20] sm:$0xff]   ;;  %v903_v6 = vld [vmem:[#allocation6 + $0x28] sm:$0xff]   ;;  %v904_v9 = vld [vmem:[#allocation6 + $0x30] sm:$0xff]   ;;  %s1010_s13 = scalar_lea.vmem %s678_s1, 1024  ;;  %p1015_p5 = scmp.lt.s32.totalorder %s678_s1, %s678_s1 }
  0x4d   :  { %829 = vmatprep.subr.bf16.mxu0 %v899_v1  ;;  %v914_v7 = vld [vmem:[#allocation9] sm:$0xff]   ;;  %v915_v8 = vld [vmem:[#allocation9 + $0x8] sm:$0xff]   ;;  %v916_v10 = vld [vmem:[#allocation9 + $0x10] sm:$0xff]   ;;  %p1011_p4 = scmp.ne.s32.totalorder %s678_s1, %s1010_s13  ;;  %p1016_p6 = scmp.lt.s32.totalorder %s1010_s13, %s1010_s13 }
  0x4e   :  { %859 = vmatprep.subr.bf16.mxu1 %v914_v7  ;;  %v905_v11 = vld [vmem:[#allocation6 + $0x38] sm:$0xff]   ;;  %v918_v13 = vld [vmem:[#allocation9 + $0x20] sm:$0xff]   ;;  %v908_v15 = vld [vmem:[#allocation3 + $0x10] sm:$0xff]  }
  0x4f   :  { %860 = vmatpush3.bf16.msra.mxu1 %v914_v7  ;;  %v917_v12 = vld [vmem:[#allocation9 + $0x18] sm:$0xff]   ;;  %v907_v14 = vld [vmem:[#allocation3 + $0x8] sm:$0xff]   ;;  %v912_v20 = vld [vmem:[#allocation3 + $0x30] sm:$0xff]   ;;  %p1017_p7 = por %p1016_p6, %p1015_p5 }
  0x50   :  { %830 = vmatpush3.bf16.msra.mxu0 %v899_v1  ;;  %861 = vmatprep.subr.bf16.mxu1 %v915_v8  ;;  %v919_v16 = vld [vmem:[#allocation9 + $0x28] sm:$0xff]   ;;  %v909_v17 = vld [vmem:[#allocation3 + $0x18] sm:$0xff]   ;;  %v910_v18 = vld [vmem:[#allocation3 + $0x20] sm:$0xff]  }
  0x51   :  { %831 = vmatprep.subr.bf16.mxu0 %v900_v2  ;;  %v911_v19 = vld [vmem:[#allocation3 + $0x28] sm:$0xff]   ;;  %v913_v21 = vld [vmem:[#allocation3 + $0x38] sm:$0xff]   ;;  %v707_v24 = vld [vmem:[#allocation8] ss:$0 sm:$0xff]  ;;  %p1018_p8 = pnand %p1017_p7, %p1011_p4 }
  0x52   :  { %v920_v22 = vld [vmem:[#allocation9 + $0x30] sm:$0xff]   ;;  %v921_v23 = vld [vmem:[#allocation9 + $0x38] sm:$0xff]  }
  0x53   :  { %862 = vmatpush3.bf16.msra.mxu1 %v915_v8 }
  0x54   :  { %832 = vmatpush3.bf16.msra.mxu0 %v900_v2  ;;  %863 = vmatprep.subr.bf16.mxu1 %v916_v10 }
  0x55   :  { %833 = vmatprep.subr.bf16.mxu0 %v901_v3 }
  0x57   :  { %864 = vmatpush3.bf16.msra.mxu1 %v916_v10 }
  0x58   :  { %834 = vmatpush3.bf16.msra.mxu0 %v901_v3  ;;  %865 = vmatprep.subr.bf16.mxu1 %v917_v12 }
  0x59   :  { %835 = vmatprep.subr.bf16.mxu0 %v902_v5 }
  0x5b   :  { %866 = vmatpush3.bf16.msra.mxu1 %v917_v12 }
  0x5c   :  { %836 = vmatpush3.bf16.msra.mxu0 %v902_v5  ;;  %867 = vmatprep.subr.bf16.mxu1 %v918_v13 }
  0x5d   :  { %837 = vmatprep.subr.bf16.mxu0 %v903_v6 }
  0x5f   :  { %868 = vmatpush3.bf16.msra.mxu1 %v918_v13 }
  0x60   :  { %838 = vmatpush3.bf16.msra.mxu0 %v903_v6  ;;  %869 = vmatprep.subr.bf16.mxu1 %v919_v16 }
  0x61   :  { %839 = vmatprep.subr.bf16.mxu0 %v904_v9 }
  0x63   :  { %870 = vmatpush3.bf16.msra.mxu1 %v919_v16 }
  0x64   :  { %840 = vmatpush3.bf16.msra.mxu0 %v904_v9  ;;  %871 = vmatprep.subr.bf16.mxu1 %v920_v22 }
  0x65   :  { %841 = vmatprep.subr.bf16.mxu0 %v905_v11 }
  0x67   :  { %872 = vmatpush3.bf16.msra.mxu1 %v920_v22 }
  0x68   :  { %842 = vmatpush3.bf16.msra.mxu0 %v905_v11  ;;  %873 = vmatprep.subr.bf16.mxu1 %v921_v23 }
  0x6b   :  { %844 = vmatmul.mubr.bf16.vlgmr.msra.gmra.mrb[0].mxu0 %v907_v14  ;;  %874 = vmatpush3.bf16.msra.mxu1 %v921_v23 }
  0x6c   :  { %847 = vmatprep.mubr.bf16.mxu0 %v908_v15 }
  0x73   :  { %848 = vmatmul.mubr.bf16.gmra.mrb[4].mxu0 %v909_v17 }
  0x74   :  { %851 = vmatprep.mubr.bf16.mxu0 %v910_v18 }
  0x7b   :  { %852 = vmatmul.mubr.bf16.gmra.mrb[8].mxu0 %v911_v19 }
  0x7c   :  { %855 = vmatprep.mubr.bf16.mxu0 %v912_v20 }
  0x83   :  { %856 = vmatmul.mubr.bf16.gmra.mrb[12].mxu0 %v913_v21 }
 0x13e   :  { %v845_v25 = vpop.f32.mrb[0].mxu0 }
 0x13f   :  { %v393_v26 = vadd.f32 %v845_v25, %v707_v24  ;;  %v270_v27 = vpop.f32.mrb[1].mxu0 }
 0x140   :  { %v391_v28 = vadd.f32 %v707_v24, %v270_v27  ;;  %v846_v29 = vpop.f32.mrb[2].mxu0 }
 0x141   :  { %v394_v30 = vadd.f32 %v846_v29, %v707_v24  ;;  %v273_v31 = vpop.f32.mrb[3].mxu0  ;;  %v409_v33 = vmax.f32 %v393_v26, 0.0 }
 0x142   :  { %v392_v32 = vadd.f32 %v707_v24, %v273_v31  ;;  %v407_v35 = vmax.f32 %v391_v28, 0.0 }
 0x143   :  { %v410_v34 = vmax.f32 %v394_v30, 0.0 }
 0x144   :  { %v408_v36 = vmax.f32 %v392_v32, 0.0 }
 0x145   :  { %v424_v37 = vpack.c.bf16 %v410_v34, %v409_v33 }
 0x146   :  { %v849_v38 = vpop.f32.mrb[4].mxu0  ;;  %v423_v39 = vpack.c.bf16 %v408_v36, %v407_v35 }
 0x147   :  { %v397_v40 = vadd.f32 %v849_v38, %v707_v24  ;;  %v286_v41 = vpop.f32.mrb[5].mxu0 }
 0x148   :  { %v395_v42 = vadd.f32 %v707_v24, %v286_v41  ;;  %v850_v43 = vpop.f32.mrb[6].mxu0  ;;  %875 = vmatprep.mubr.bf16.mxu1 %v423_v39 }
 0x149   :  { %v398_v44 = vadd.f32 %v850_v43, %v707_v24  ;;  %v289_v45 = vpop.f32.mrb[7].mxu0  ;;  %876 = vmatmul.mubr.bf16.vlgmr.msra.gmra.mrb[0].mxu1 %v424_v37  ;;  %v413_v47 = vmax.f32 %v397_v40, 0.0 }
 0x14a   :  { %v396_v46 = vadd.f32 %v707_v24, %v289_v45  ;;  %v411_v49 = vmax.f32 %v395_v42, 0.0 }
 0x14b   :  { %v414_v48 = vmax.f32 %v398_v44, 0.0 }
 0x14c   :  { %v412_v50 = vmax.f32 %v396_v46, 0.0 }
 0x14d   :  { %v426_v51 = vpack.c.bf16 %v414_v48, %v413_v47 }
 0x14e   :  { %v425_v52 = vpack.c.bf16 %v412_v50, %v411_v49  ;;  %v853_v53 = vpop.f32.mrb[8].mxu0 }
 0x14f   :  { %v401_v54 = vadd.f32 %v853_v53, %v707_v24  ;;  %v302_v55 = vpop.f32.mrb[9].mxu0 }
 0x150   :  { %v399_v56 = vadd.f32 %v707_v24, %v302_v55  ;;  %v854_v57 = vpop.f32.mrb[10].mxu0  ;;  %879 = vmatprep.mubr.bf16.mxu1 %v425_v52 }
 0x151   :  { %v402_v58 = vadd.f32 %v854_v57, %v707_v24  ;;  %v305_v59 = vpop.f32.mrb[11].mxu0  ;;  %880 = vmatmul.mubr.bf16.gmra.mrb[4].mxu1 %v426_v51  ;;  %v417_v61 = vmax.f32 %v401_v54, 0.0 }
 0x152   :  { %v400_v60 = vadd.f32 %v707_v24, %v305_v59  ;;  %v415_v63 = vmax.f32 %v399_v56, 0.0 }
 0x153   :  { %v418_v62 = vmax.f32 %v402_v58, 0.0 }
 0x154   :  { %v416_v0 = vmax.f32 %v400_v60, 0.0 }
 0x155   :  { %v428_v1 = vpack.c.bf16 %v418_v62, %v417_v61 }
 0x156   :  { %v427_v2 = vpack.c.bf16 %v416_v0, %v415_v63  ;;  %v857_v3 = vpop.f32.mrb[12].mxu0 }
 0x157   :  { %v405_v4 = vadd.f32 %v857_v3, %v707_v24  ;;  %v318_v5 = vpop.f32.mrb[13].mxu0 }
 0x158   :  { %v403_v6 = vadd.f32 %v707_v24, %v318_v5  ;;  %v858_v7 = vpop.f32.mrb[14].mxu0  ;;  %883 = vmatprep.mubr.bf16.mxu1 %v427_v2 }
 0x159   :  { %v406_v8 = vadd.f32 %v858_v7, %v707_v24  ;;  %v321_v9 = vpop.f32.mrb[15].mxu0  ;;  %884 = vmatmul.mubr.bf16.gmra.mrb[8].mxu1 %v428_v1  ;;  %v421_v11 = vmax.f32 %v405_v4, 0.0 }
 0x15a   :  { %v404_v10 = vadd.f32 %v707_v24, %v321_v9  ;;  %v419_v13 = vmax.f32 %v403_v6, 0.0 }
 0x15b   :  { %v422_v12 = vmax.f32 %v406_v8, 0.0 }
 0x15c   :  { %v420_v14 = vmax.f32 %v404_v10, 0.0 }
 0x15d   :  { %v430_v15 = vpack.c.bf16 %v422_v12, %v421_v11 }
 0x15e   :  { %v429_v16 = vpack.c.bf16 %v420_v14, %v419_v13 }
 0x160   :  { %887 = vmatprep.mubr.bf16.mxu1 %v429_v16 }
 0x161   :  { %888 = vmatmul.mubr.bf16.gmra.mrb[12].mxu1 %v430_v15 }
 0x21c   :  { %v877_v17 = vpop.f32.mrb[0].mxu1 }
 0x21d   :  { %v529_v18 = vpop.f32.mrb[1].mxu1 }
 0x21e   :  { %v878_v19 = vpop.f32.mrb[2].mxu1 }
 0x21f   :  { %v756_v20 = vpack.c.bf16 %v878_v19, %v877_v17  ;;  %v532_v21 = vpop.f32.mrb[3].mxu1 }
 0x220   :  { %v751_v22 = vpack.c.bf16 %v532_v21, %v529_v18 }
 0x221   :  { %788 = vst [vmem:[#allocation11 + $0x8] sm:$0xff] %v756_v20  }
 0x222   :  { %752 = vst [vmem:[#allocation11] sm:$0xff] %v751_v22  }
 0x224   :  { %v881_v23 = vpop.f32.mrb[4].mxu1 }
 0x225   :  { %v545_v25 = vpop.f32.mrb[5].mxu1 }
 0x226   :  { %v882_v26 = vpop.f32.mrb[6].mxu1 }
 0x227   :  { %v766_v24 = vpack.c.bf16 %v882_v26, %v881_v23  ;;  %v548_v27 = vpop.f32.mrb[7].mxu1 }
 0x228   :  { %v761_v28 = vpack.c.bf16 %v548_v27, %v545_v25 }
 0x229   :  { %790 = vst [vmem:[#allocation11 + $0x18] sm:$0xff] %v766_v24  }
 0x22a   :  { %789 = vst [vmem:[#allocation11 + $0x10] sm:$0xff] %v761_v28  }
 0x22c   :  { %v885_v29 = vpop.f32.mrb[8].mxu1 }
 0x22d   :  { %v561_v30 = vpop.f32.mrb[9].mxu1 }
 0x22e   :  { %v886_v31 = vpop.f32.mrb[10].mxu1 }
 0x22f   :  { %v776_v32 = vpack.c.bf16 %v886_v31, %v885_v29  ;;  %v564_v33 = vpop.f32.mrb[11].mxu1 }
 0x230   :  { %v771_v34 = vpack.c.bf16 %v564_v33, %v561_v30 }
 0x231   :  { %792 = vst [vmem:[#allocation11 + $0x28] sm:$0xff] %v776_v32  }
 0x232   :  { %791 = vst [vmem:[#allocation11 + $0x20] sm:$0xff] %v771_v34  }
 0x234   :  { %v889_v35 = vpop.f32.mrb[12].mxu1 }
 0x235   :  { %v577_v36 = vpop.f32.mrb[13].mxu1 }
 0x236   :  { %v890_v37 = vpop.f32.mrb[14].mxu1 }
 0x237   :  { %v786_v38 = vpack.c.bf16 %v890_v37, %v889_v35  ;;  %v580_v39 = vpop.f32.mrb[15].mxu1 }
 0x238   :  { %v781_v40 = vpack.c.bf16 %v580_v39, %v577_v36 }
 0x239   :  { %794 = vst [vmem:[#allocation11 + $0x38] sm:$0xff] %v786_v38  }
 0x23a   :  { %793 = vst [vmem:[#allocation11 + $0x30] sm:$0xff] %v781_v40  }
 0x23b   :  { %1021 = shalt.err (!%p1018_p8)
}
 0x23c   :  { %s1022_s16 = scalar_lea.hbm %s1162_s4, 1024 }
 0x23d   :  { %p1023_p9 = scmp.ne.s32.totalorder %s1162_s4, %s1022_s16  ;;  %p1026_p10 = scmp.lt.u32.totalorder %s1022_s16, %s1162_s4 }
 0x23f   :  { %p1028_p11 = pnand %p1026_p10, %p1023_p9 }
 0x241   :  { %1031 = shalt.err (!%p1028_p11)
}
 0x242   :  { %683 = dma.vmem_to_hbm [thread:$0]  %s678_s1, 1024, %s1162_s4, [#allocation5], %s1042_s27, %s1042_s27, %s1043_s28  }
 0x243   :  { %1038 = dma.done.wait [#allocation5], 1024  }
 0x244   :  { %1039 = vsyncadd [#allocation5], 4294966272 }
 0x245   :  { %687 = vsyncpa [#allocation4], 1 }
 0x246   :  { %688 = vsyncpa [#allocation7], 1 }
 0x247   :  { %689 = vsyncpa [#allocation10], 1 }
 0x248   :  { %690 = vsyncpa [#allocation5], 1 }

// kernel: gcn_net_forward.5
= control target key start
LH: loop header
LB: loop body
LE: loop exit
PB: predicated region body
PF: predicated region fallthrough
CT: control target
= control target key end

     0   :  { %8 = vsyncpa [#allocation4], 0  ;;  %s1112_s0 = inlined_call_operand.hbm [shape: bf16[128,128], index: 0, kind: input, shape index: {}]   ;;  %s1113_s1 = inlined_call_operand.hbm [shape: bf16[128,128], index: 1, kind: input, shape index: {}]   ;;  %s1114_s2 = inlined_call_operand.hbm [shape: f32[1,128], index: 2, kind: input, shape index: {}]   ;;  %s1115_s3 = inlined_call_operand.hbm [shape: f32[128,128], index: 3, kind: output, shape index: {}]  }
   0x1   :  { %9 = vsyncpa [#allocation7], 0 }
   0x2   :  { %10 = vsyncpa [#allocation5], 0  ;;  %s882_s12 = smov [#allocation6]   ;;  %s883_s14 = smov [#allocation3]  }
   0x3   :  { %s28_s13 = sshll.u32 %s882_s12, 4  ;;  %s16_s15 = sshll.u32 %s883_s14, 4  ;;  %s29_s13 = int_to_ptr.vmem [resolvable:$true] %s28_s13  ;;  %s910_s15 = int_to_ptr.vmem [resolvable:$true] %s16_s15 }
   0x4   :  { %s788_s18 = scalar_lea.hbm %s1113_s1, 1024 }
   0x5   :  { %p789_p0 = scmp.ne.s32.totalorder %s1113_s1, %s788_s18  ;;  %p792_p1 = scmp.lt.u32.totalorder %s788_s18, %s1113_s1 }
   0x7   :  { %p794_p2 = pnand %p792_p1, %p789_p0 }
   0x9   :  { %797 = shalt.err (!%p794_p2)
}
   0xa   :  { %s798_s23 = scalar_lea.vmem %s29_s13, 1024  ;;  %p803_p4 = scmp.lt.s32.totalorder %s29_s13, %s29_s13 }
   0xb   :  { %p799_p3 = scmp.ne.s32.totalorder %s29_s13, %s798_s23  ;;  %p804_p5 = scmp.lt.s32.totalorder %s798_s23, %s798_s23 }
   0xd   :  { %p805_p6 = por %p804_p5, %p803_p4 }
   0xf   :  { %p806_p7 = pnand %p805_p6, %p799_p3 }
  0x11   :  { %809 = shalt.err (!%p806_p7)
}
  0x12   :  { %s884_s24 = smov 64   ;;  %s885_s25 = smov 4  }
  0x13   :  { %34 = dma.hbm_to_vmem [thread:$0]  %s1113_s1, 1024, %s29_s13, [#allocation7], %s884_s24, %s884_s24, %s885_s25  }
  0x14   :  { %s810_s30 = scalar_lea.hbm %s1112_s0, 1024 }
  0x15   :  { %p811_p8 = scmp.ne.s32.totalorder %s1112_s0, %s810_s30  ;;  %p814_p9 = scmp.lt.u32.totalorder %s810_s30, %s1112_s0 }
  0x17   :  { %p816_p10 = pnand %p814_p9, %p811_p8 }
  0x19   :  { %819 = shalt.err (!%p816_p10)
}
  0x1a   :  { %s820_s8 = scalar_lea.vmem %s910_s15, 1024  ;;  %p825_p12 = scmp.lt.s32.totalorder %s910_s15, %s910_s15 }
  0x1b   :  { %p821_p11 = scmp.ne.s32.totalorder %s910_s15, %s820_s8  ;;  %p826_p13 = scmp.lt.s32.totalorder %s820_s8, %s820_s8 }
  0x1d   :  { %p827_p0 = por %p826_p13, %p825_p12 }
  0x1f   :  { %p828_p1 = pnand %p827_p0, %p821_p11 }
  0x21   :  { %831 = shalt.err (!%p828_p1)
}
  0x22   :  { %22 = dma.hbm_to_vmem [thread:$0]  %s1112_s0, 1024, %s910_s15, [#allocation4], %s884_s24, %s884_s24, %s885_s25  }
  0x23   :  { %s886_s10 = smov [#allocation8]   ;;  %s832_s14 = scalar_lea.hbm %s1114_s2, 16 }
  0x24   :  { %s41_s11 = sshll.u32 %s886_s10, 4  ;;  %p833_p2 = scmp.ne.s32.totalorder %s1114_s2, %s832_s14  ;;  %s42_s11 = int_to_ptr.vmem [resolvable:$true] %s41_s11 }
  0x25   :  { %p836_p3 = scmp.lt.u32.totalorder %s832_s14, %s1114_s2 }
  0x27   :  { %p838_p4 = pnand %p836_p3, %p833_p2 }
  0x29   :  { %841 = shalt.err (!%p838_p4)
}
  0x2a   :  { %s842_s20 = scalar_lea.vmem %s42_s11, 16  ;;  %s846_s0 = scalar_lea.vmem %s42_s11, 32 }
  0x2b   :  { %p843_p5 = scmp.ne.s32.totalorder %s42_s11, %s842_s20  ;;  %p847_p6 = scmp.lt.s32.totalorder %s42_s11, %s42_s11 }
  0x2c   :  { %p848_p7 = scmp.lt.s32.totalorder %s846_s0, %s842_s20 }
  0x2e   :  { %p849_p8 = por %p848_p7, %p847_p6 }
  0x30   :  { %p850_p9 = pnand %p849_p8, %p843_p5 }
  0x32   :  { %853 = shalt.err (!%p850_p9)
}
  0x33   :  { %44 = dma.hbm_to_vmem [thread:$0]  %s1114_s2, 16, %s42_s11, [#allocation7]  }
  0x34   :  { %876 = dma.done.wait [#allocation4], 1024  }
  0x35   :  { %877 = vsyncadd [#allocation4], 4294966272 }
  0x36   :  { %878 = dma.done.wait [#allocation7], 1040  }
  0x37   :  { %879 = vsyncadd [#allocation7], 4294966256  ;;  %v708_v0 = vld [vmem:[#allocation6] sm:$0xff]   ;;  %v709_v1 = vld [vmem:[#allocation6 + $0x8] sm:$0xff]   ;;  %v390_v16 = vlaneseq  ;;  %s887_s2 = smov [#allocation9]  }
  0x38   :  { %652 = vmatprep.subr.bf16.mxu0 %v708_v0  ;;  %684 = vmatprep.subr.bf16.mxu1 %v708_v0  ;;  %v710_v2 = vld [vmem:[#allocation6 + $0x10] sm:$0xff]   ;;  %v711_v3 = vld [vmem:[#allocation6 + $0x18] sm:$0xff]   ;;  %v716_v4 = vld [vmem:[#allocation3] sm:$0xff]   ;;  %s606_s22 = sshll.u32 %s887_s2, 4  ;;  %s607_s22 = int_to_ptr.vmem [resolvable:$true] %s606_s22 }
  0x39   :  { %653 = vmatpush3.bf16.msra.mxu0 %v708_v0  ;;  %692 = vmatpush3.bf16.msra.mxu1 %v708_v0  ;;  %v717_v5 = vld [vmem:[#allocation3 + $0x20] sm:$0xff]   ;;  %v713_v7 = vld [vmem:[#allocation6 + $0x28] sm:$0xff]   ;;  %v714_v8 = vld [vmem:[#allocation6 + $0x30] sm:$0xff]   ;;  %v953_v17 = vand.u32 127, %v390_v16  ;;  %s854_s23 = scalar_lea.vmem %s607_s22, 2048  ;;  %p859_p11 = scmp.lt.s32.totalorder %s607_s22, %s607_s22 }
  0x3a   :  { %654 = vmatprep.subr.bf16.mxu0 %v709_v1  ;;  %685 = vmatprep.subr.bf16.mxu1 %v709_v1  ;;  %v712_v6 = vld [vmem:[#allocation6 + $0x20] sm:$0xff]   ;;  %v715_v9 = vld [vmem:[#allocation6 + $0x38] sm:$0xff]   ;;  %v718_v10 = vld [vmem:[#allocation3 + $0x8] sm:$0xff]   ;;  %p855_p10 = scmp.ne.s32.totalorder %s607_s22, %s854_s23  ;;  %p860_p12 = scmp.lt.s32.totalorder %s854_s23, %s854_s23 }
  0x3b   :  { %668 = vmatprep.mubr.bf16.mxu0 %v716_v4  ;;  %676 = vmatprep.mubr.bf16.mxu1 %v717_v5  ;;  %v719_v11 = vld [vmem:[#allocation3 + $0x28] sm:$0xff]   ;;  %v720_v12 = vld [vmem:[#allocation3 + $0x10] sm:$0xff]   ;;  %v721_v14 = vld [vmem:[#allocation3 + $0x18] sm:$0xff]   ;;  %vm392_vm0 = vcmp.lt.s32.totalorder %v953_v17, 4 }
  0x3c   :  { %v722_v13 = vld [vmem:[#allocation3 + $0x30] sm:$0xff]   ;;  %v723_v15 = vld [vmem:[#allocation3 + $0x38] sm:$0xff]   ;;  %v635_v18 = vld [vmem:[#allocation8] ss:$0 sm:$0xff]  ;;  %p861_p13 = por %p860_p12, %p859_p11 }
  0x3d   :  { %655 = vmatpush3.bf16.msra.mxu0 %v709_v1  ;;  %693 = vmatpush3.bf16.msra.mxu1 %v709_v1 }
  0x3e   :  { %656 = vmatprep.subr.bf16.mxu0 %v710_v2  ;;  %686 = vmatprep.subr.bf16.mxu1 %v710_v2  ;;  %p862_p0 = pnand %p861_p13, %p855_p10 }
  0x41   :  { %657 = vmatpush3.bf16.msra.mxu0 %v710_v2  ;;  %694 = vmatpush3.bf16.msra.mxu1 %v710_v2 }
  0x42   :  { %658 = vmatprep.subr.bf16.mxu0 %v711_v3  ;;  %687 = vmatprep.subr.bf16.mxu1 %v711_v3 }
  0x45   :  { %659 = vmatpush3.bf16.msra.mxu0 %v711_v3  ;;  %695 = vmatpush3.bf16.msra.mxu1 %v711_v3 }
  0x46   :  { %660 = vmatprep.subr.bf16.mxu0 %v712_v6  ;;  %688 = vmatprep.subr.bf16.mxu1 %v712_v6 }
  0x49   :  { %661 = vmatpush3.bf16.msra.mxu0 %v712_v6  ;;  %696 = vmatpush3.bf16.msra.mxu1 %v712_v6 }
  0x4a   :  { %662 = vmatprep.subr.bf16.mxu0 %v713_v7  ;;  %689 = vmatprep.subr.bf16.mxu1 %v713_v7 }
  0x4d   :  { %663 = vmatpush3.bf16.msra.mxu0 %v713_v7  ;;  %697 = vmatpush3.bf16.msra.mxu1 %v713_v7 }
  0x4e   :  { %664 = vmatprep.subr.bf16.mxu0 %v714_v8  ;;  %690 = vmatprep.subr.bf16.mxu1 %v714_v8 }
  0x51   :  { %665 = vmatpush3.bf16.msra.mxu0 %v714_v8  ;;  %698 = vmatpush3.bf16.msra.mxu1 %v714_v8 }
  0x52   :  { %666 = vmatprep.subr.bf16.mxu0 %v715_v9  ;;  %691 = vmatprep.subr.bf16.mxu1 %v715_v9 }
  0x55   :  { %667 = vmatpush3.bf16.msra.mxu0 %v715_v9  ;;  %699 = vmatpush3.bf16.msra.mxu1 %v715_v9 }
  0x58   :  { %669 = vmatmul.mubr.bf16.vlgmr.msra.gmra.mrb[0].mxu0 %v718_v10  ;;  %677 = vmatmul.mubr.bf16.vlgmr.msra.gmra.mrb[0].mxu1 %v719_v11 }
  0x59   :  { %672 = vmatprep.mubr.bf16.mxu0 %v720_v12  ;;  %680 = vmatprep.mubr.bf16.mxu1 %v722_v13 }
  0x60   :  { %673 = vmatmul.mubr.bf16.gmra.mrb[4].mxu0 %v721_v14  ;;  %681 = vmatmul.mubr.bf16.gmra.mrb[4].mxu1 %v723_v15 }
 0x12b   :  { %v670_v19 = vpop.f32.mrb[0].mxu0  ;;  %v678_v20 = vpop.f32.mrb[0].mxu1 }
 0x12c   :  { %v376_v21 = vadd.f32 %v670_v19, %v635_v18  ;;  %v384_v22 = vadd.f32 %v678_v20, %v635_v18  ;;  %v253_v23 = vpop.f32.mrb[1].mxu0  ;;  %v285_v24 = vpop.f32.mrb[1].mxu1 }
 0x12d   :  { %v671_v25 = vpop.f32.mrb[2].mxu0  ;;  %v679_v26 = vpop.f32.mrb[2].mxu1  ;;  %v374_v27 = vadd.f32 %v635_v18, %v253_v23  ;;  %v382_v33 = vadd.f32 %v635_v18, %v285_v24 }
 0x12e   :  { %v377_v28 = vadd.f32 %v671_v25, %v635_v18  ;;  %v256_v29 = vpop.f32.mrb[3].mxu0  ;;  %v288_v30 = vpop.f32.mrb[3].mxu1  ;;  %v403_v31 = vsel %vm392_vm0, %v384_v22, -inf  ;;  %v395_v32 = vsel %vm392_vm0, %v376_v21, -inf  ;;  %v385_v34 = vadd.f32 %v679_v26, %v635_v18 }
 0x12f   :  { %429 = vmax.xlane.f32.xlu0 %v403_v31  ;;  %413 = vmax.xlane.f32.xlu1 %v395_v32  ;;  %v393_v35 = vsel %vm392_vm0, %v374_v27, -inf  ;;  %v375_v43 = vadd.f32 %v635_v18, %v256_v29  ;;  %v383_v44 = vadd.f32 %v635_v18, %v288_v30  ;;  %v401_v45 = vsel %vm392_vm0, %v382_v33, -inf }
 0x130   :  { %v396_v36 = vsel %vm392_vm0, %v377_v28, -inf  ;;  %v404_v46 = vsel %vm392_vm0, %v385_v34, -inf }
 0x131   :  { %v402_v51 = vsel %vm392_vm0, %v383_v44, -inf  ;;  %v394_v52 = vsel %vm392_vm0, %v375_v43, -inf }
 0x133   :  { %409 = vmax.xlane.f32.xlu0 %v393_v35  ;;  %415 = vmax.xlane.f32.xlu1 %v396_v36  ;;  %v674_v37 = vpop.f32.mrb[4].mxu0  ;;  %v682_v38 = vpop.f32.mrb[4].mxu1 }
 0x134   :  { %v269_v39 = vpop.f32.mrb[5].mxu0  ;;  %v301_v40 = vpop.f32.mrb[5].mxu1  ;;  %v380_v49 = vadd.f32 %v674_v37, %v635_v18  ;;  %v388_v63 = vadd.f32 %v682_v38, %v635_v18 }
 0x135   :  { %v675_v41 = vpop.f32.mrb[6].mxu0  ;;  %v683_v42 = vpop.f32.mrb[6].mxu1  ;;  %v378_v55 = vadd.f32 %v635_v18, %v269_v39  ;;  %v386_v57 = vadd.f32 %v635_v18, %v301_v40 }
 0x136   :  { %v272_v47 = vpop.f32.mrb[7].mxu0  ;;  %v304_v48 = vpop.f32.mrb[7].mxu1  ;;  %v381_v50 = vadd.f32 %v675_v41, %v635_v18  ;;  %v399_v53 = vsel %vm392_vm0, %v380_v49, -inf  ;;  %v389_v0 = vadd.f32 %v683_v42, %v635_v18  ;;  %v992_v1 = vsel %vm392_vm0, %v388_v63, -inf }
 0x137   :  { %425 = vmax.xlane.f32.xlu0 %v401_v45  ;;  %431 = vmax.xlane.f32.xlu1 %v404_v46  ;;  %v379_v56 = vadd.f32 %v635_v18, %v272_v47  ;;  %v387_v58 = vadd.f32 %v635_v18, %v304_v48  ;;  %v397_v59 = vsel %vm392_vm0, %v378_v55, -inf  ;;  %v982_v61 = vsel %vm392_vm0, %v386_v57, -inf }
 0x138   :  { %v400_v54 = vsel %vm392_vm0, %v381_v50, -inf  ;;  %v996_v2 = vsel %vm392_vm0, %v389_v0, -inf }
 0x139   :  { %v398_v60 = vsel %vm392_vm0, %v379_v56, -inf  ;;  %v986_v62 = vsel %vm392_vm0, %v387_v58, -inf }
 0x13b   :  { %427 = vmax.xlane.f32.xlu1 %v402_v51  ;;  %411 = vmax.xlane.f32.xlu0 %v394_v52 }
 0x13f   :  { %421 = vmax.xlane.f32.xlu0 %v399_v53  ;;  %423 = vmax.xlane.f32.xlu1 %v400_v54 }
 0x143   :  { %417 = vmax.xlane.f32.xlu0 %v397_v59  ;;  %419 = vmax.xlane.f32.xlu1 %v398_v60 }
 0x147   :  { %433 = vmax.xlane.f32.xlu0 %v982_v61  ;;  %435 = vmax.xlane.f32.xlu1 %v986_v62 }
 0x14b   :  { %437 = vmax.xlane.f32.xlu0 %v992_v1  ;;  %439 = vmax.xlane.f32.xlu1 %v996_v2 }
 0x1bc   :  { %v430_v3 = vpop.xlane.xlu0 %429  ;;  %v414_v4 = vpop.xlane.xlu1 %413 }
 0x1bd   :  { %v1000_v5 = vsub.f32 %v403_v31, %v430_v3  ;;  %v1002_v6 = vsub.f32 %v395_v32, %v414_v4 }
 0x1bf   :  { %v461_v7 = vmul.f32 1.442695, %v1002_v6  ;;  %v477_v10 = vmul.f32 1.442695, %v1000_v5 }
 0x1c0   :  { %v410_v8 = vpop.xlane.xlu0 %409  ;;  %v416_v9 = vpop.xlane.xlu1 %415 }
 0x1c1   :  { %v1006_v11 = vsub.f32 %v393_v35, %v410_v8  ;;  %v1008_v12 = vsub.f32 %v396_v36, %v416_v9  ;;  %724 = vpow2.f32 %v461_v7 }
 0x1c2   :  { %726 = vpow2.f32 %v477_v10 }
 0x1c3   :  { %v463_v13 = vmul.f32 1.442695, %v1008_v12  ;;  %v457_v16 = vmul.f32 1.442695, %v1006_v11 }
 0x1c4   :  { %v426_v14 = vpop.xlane.xlu0 %425  ;;  %v432_v15 = vpop.xlane.xlu1 %431 }
 0x1c5   :  { %v1012_v18 = vsub.f32 %v401_v45, %v426_v14  ;;  %v1014_v19 = vsub.f32 %v404_v46, %v432_v15  ;;  %728 = vpow2.f32 %v463_v13 }
 0x1c6   :  { %730 = vpow2.f32 %v457_v16 }
 0x1c7   :  { %v479_v20 = vmul.f32 1.442695, %v1014_v19  ;;  %v473_v23 = vmul.f32 1.442695, %v1012_v18 }
 0x1c8   :  { %v428_v21 = vpop.xlane.xlu1 %427  ;;  %v412_v22 = vpop.xlane.xlu0 %411 }
 0x1c9   :  { %v1018_v24 = vsub.f32 %v394_v52, %v412_v22  ;;  %732 = vpow2.f32 %v479_v20  ;;  %v1020_v25 = vsub.f32 %v402_v51, %v428_v21 }
 0x1ca   :  { %734 = vpow2.f32 %v473_v23 }
 0x1cb   :  { %v459_v26 = vmul.f32 1.442695, %v1018_v24  ;;  %v725_v27 = vpop.eup %724  ;;  %v475_v31 = vmul.f32 1.442695, %v1020_v25 }
 0x1cc   :  { %v422_v28 = vpop.xlane.xlu0 %421  ;;  %v424_v29 = vpop.xlane.xlu1 %423  ;;  %493 = vadd.xlane.f32.xlu0 %v725_v27 }
 0x1cd   :  { %v1023_v30 = vsub.f32 %v399_v53, %v422_v28  ;;  %736 = vpow2.f32 %v459_v26  ;;  %v1026_v32 = vsub.f32 %v400_v54, %v424_v29  ;;  %v727_v33 = vpop.eup %726 }
 0x1cf   :  { %v469_v34 = vmul.f32 1.442695, %v1023_v30  ;;  %v729_v35 = vpop.eup %728  ;;  %v471_v39 = vmul.f32 1.442695, %v1026_v32 }
 0x1d0   :  { %v418_v36 = vpop.xlane.xlu0 %417  ;;  %v420_v37 = vpop.xlane.xlu1 %419  ;;  %509 = vadd.xlane.f32.xlu0 %v727_v33  ;;  %495 = vadd.xlane.f32.xlu1 %v729_v35 }
 0x1d1   :  { %738 = vpow2.f32 %v469_v34  ;;  %v1029_v38 = vsub.f32 %v397_v59, %v418_v36  ;;  %v1032_v40 = vsub.f32 %v398_v60, %v420_v37  ;;  %v731_v41 = vpop.eup %730 }
 0x1d2   :  { %740 = vpow2.f32 %v475_v31 }
 0x1d3   :  { %v465_v42 = vmul.f32 1.442695, %v1029_v38  ;;  %v733_v43 = vpop.eup %732  ;;  %v467_v47 = vmul.f32 1.442695, %v1032_v40 }
 0x1d4   :  { %v434_v44 = vpop.xlane.xlu0 %433  ;;  %v436_v45 = vpop.xlane.xlu1 %435  ;;  %489 = vadd.xlane.f32.xlu0 %v731_v41  ;;  %511 = vadd.xlane.f32.xlu1 %v733_v43 }
 0x1d5   :  { %742 = vpow2.f32 %v465_v42  ;;  %v1036_v46 = vsub.f32 %v982_v61, %v434_v44  ;;  %v1040_v48 = vsub.f32 %v986_v62, %v436_v45  ;;  %v735_v49 = vpop.eup %734 }
 0x1d6   :  { %744 = vpow2.f32 %v471_v39 }
 0x1d7   :  { %v481_v50 = vmul.f32 1.442695, %v1036_v46  ;;  %v737_v51 = vpop.eup %736  ;;  %v483_v55 = vmul.f32 1.442695, %v1040_v48 }
 0x1d8   :  { %v438_v52 = vpop.xlane.xlu0 %437  ;;  %v440_v53 = vpop.xlane.xlu1 %439  ;;  %505 = vadd.xlane.f32.xlu0 %v735_v49  ;;  %491 = vadd.xlane.f32.xlu1 %v737_v51 }
 0x1d9   :  { %746 = vpow2.f32 %v481_v50  ;;  %v1044_v54 = vsub.f32 %v992_v1, %v438_v52  ;;  %v1048_v56 = vsub.f32 %v996_v2, %v440_v53 }
 0x1da   :  { %748 = vpow2.f32 %v467_v47 }
 0x1db   :  { %v739_v57 = vpop.eup %738  ;;  %v485_v58 = vmul.f32 1.442695, %v1044_v54  ;;  %v487_v60 = vmul.f32 1.442695, %v1048_v56 }
 0x1dc   :  { %v741_v59 = vpop.eup %740  ;;  %501 = vadd.xlane.f32.xlu0 %v739_v57 }
 0x1dd   :  { %750 = vpow2.f32 %v485_v58  ;;  %507 = vadd.xlane.f32.xlu1 %v741_v59 }
 0x1de   :  { %752 = vpow2.f32 %v483_v55 }
 0x1df   :  { %v743_v61 = vpop.eup %742  ;;  %754 = vpow2.f32 %v487_v60 }
 0x1e0   :  { %v745_v62 = vpop.eup %744  ;;  %497 = vadd.xlane.f32.xlu0 %v743_v61 }
 0x1e1   :  { %503 = vadd.xlane.f32.xlu1 %v745_v62 }
 0x1e3   :  { %v747_v63 = vpop.eup %746 }
 0x1e4   :  { %v749_v0 = vpop.eup %748  ;;  %513 = vadd.xlane.f32.xlu0 %v747_v63 }
 0x1e5   :  { %499 = vadd.xlane.f32.xlu1 %v749_v0 }
 0x1e7   :  { %v751_v1 = vpop.eup %750 }
 0x1e8   :  { %v753_v2 = vpop.eup %752  ;;  %517 = vadd.xlane.f32.xlu0 %v751_v1 }
 0x1e9   :  { %515 = vadd.xlane.f32.xlu1 %v753_v2  ;;  %v755_v3 = vpop.eup %754 }
 0x1ed   :  { %519 = vadd.xlane.f32.xlu1 %v755_v3 }
 0x259   :  { %v494_v4 = vpop.xlane.xlu0 %493 }
 0x25a   :  { %756 = vlog2.f32 %v494_v4 }
 0x25d   :  { %v510_v7 = vpop.xlane.xlu0 %509  ;;  %v496_v8 = vpop.xlane.xlu1 %495 }
 0x25e   :  { %758 = vlog2.f32 %v510_v7 }
 0x25f   :  { %760 = vlog2.f32 %v496_v8 }
 0x261   :  { %v490_v9 = vpop.xlane.xlu0 %489  ;;  %v512_v10 = vpop.xlane.xlu1 %511 }
 0x262   :  { %762 = vlog2.f32 %v490_v9 }
 0x263   :  { %764 = vlog2.f32 %v512_v10 }
 0x264   :  { %v757_v13 = vpop.eup %756 }
 0x265   :  { %v526_v14 = vmul.f32 0.6931472, %v757_v13  ;;  %v506_v15 = vpop.xlane.xlu0 %505  ;;  %v492_v16 = vpop.xlane.xlu1 %491 }
 0x266   :  { %766 = vlog2.f32 %v506_v15 }
 0x267   :  { %v555_v20 = vsub.f32 %v1002_v6, %v526_v14  ;;  %768 = vlog2.f32 %v492_v16 }
 0x268   :  { %v759_v21 = vpop.eup %758 }
 0x269   :  { %v761_v22 = vpop.eup %760  ;;  %v571_v23 = vsel %vm392_vm0, %v555_v20, 0.0  ;;  %v542_v26 = vmul.f32 0.6931472, %v759_v21  ;;  %v502_v27 = vpop.xlane.xlu0 %501 }
 0x26a   :  { %v508_v28 = vpop.xlane.xlu1 %507  ;;  %587 = vst [vmem:[#allocation9 + $0x10] sm:$0xff] %v571_v23  ;;  %v528_v29 = vmul.f32 0.6931472, %v761_v22  ;;  %770 = vlog2.f32 %v502_v27 }
 0x26b   :  { %v563_v31 = vsub.f32 %v1000_v5, %v542_v26  ;;  %772 = vlog2.f32 %v508_v28 }
 0x26c   :  { %v763_v33 = vpop.eup %762  ;;  %v556_v34 = vsub.f32 %v1008_v12, %v528_v29 }
 0x26d   :  { %v765_v35 = vpop.eup %764  ;;  %v579_v6 = vsel %vm392_vm0, %v563_v31, 0.0  ;;  %v522_v36 = vmul.f32 0.6931472, %v763_v33  ;;  %v498_v37 = vpop.xlane.xlu0 %497 }
 0x26e   :  { %v504_v39 = vpop.xlane.xlu1 %503  ;;  %595 = vst [vmem:[#allocation9 + $0x50] sm:$0xff] %v579_v6  ;;  %v572_v41 = vsel %vm392_vm0, %v556_v34, 0.0  ;;  %v544_v42 = vmul.f32 0.6931472, %v765_v35  ;;  %774 = vlog2.f32 %v498_v37 }
 0x26f   :  { %588 = vst [vmem:[#allocation9 + $0x18] sm:$0xff] %v572_v41  ;;  %v553_v5 = vsub.f32 %v1006_v11, %v522_v36  ;;  %776 = vlog2.f32 %v504_v39 }
 0x270   :  { %v767_v43 = vpop.eup %766  ;;  %v564_v12 = vsub.f32 %v1014_v19, %v544_v42 }
 0x271   :  { %v769_v44 = vpop.eup %768  ;;  %v569_v45 = vsel %vm392_vm0, %v553_v5, 0.0  ;;  %v538_v47 = vmul.f32 0.6931472, %v767_v43  ;;  %v514_v49 = vpop.xlane.xlu0 %513 }
 0x272   :  { %v500_v50 = vpop.xlane.xlu1 %499  ;;  %585 = vst [vmem:[#allocation9] sm:$0xff] %v569_v45  ;;  %v580_v51 = vsel %vm392_vm0, %v564_v12, 0.0  ;;  %v524_v52 = vmul.f32 0.6931472, %v769_v44  ;;  %778 = vlog2.f32 %v514_v49 }
 0x273   :  { %596 = vst [vmem:[#allocation9 + $0x58] sm:$0xff] %v580_v51  ;;  %v561_v11 = vsub.f32 %v1012_v18, %v538_v47  ;;  %780 = vlog2.f32 %v500_v50 }
 0x274   :  { %v771_v53 = vpop.eup %770  ;;  %v554_v19 = vsub.f32 %v1018_v24, %v524_v52 }
 0x275   :  { %v773_v55 = vpop.eup %772  ;;  %v577_v57 = vsel %vm392_vm0, %v561_v11, 0.0  ;;  %v534_v58 = vmul.f32 0.6931472, %v771_v53  ;;  %v518_v59 = vpop.xlane.xlu0 %517 }
 0x276   :  { %v516_v60 = vpop.xlane.xlu1 %515  ;;  %593 = vst [vmem:[#allocation9 + $0x40] sm:$0xff] %v577_v57  ;;  %v570_v61 = vsel %vm392_vm0, %v554_v19, 0.0  ;;  %v540_v62 = vmul.f32 0.6931472, %v773_v55  ;;  %782 = vlog2.f32 %v518_v59 }
 0x277   :  { %586 = vst [vmem:[#allocation9 + $0x8] sm:$0xff] %v570_v61  ;;  %v559_v18 = vsub.f32 %v1023_v30, %v534_v58  ;;  %784 = vlog2.f32 %v516_v60 }
 0x278   :  { %v775_v63 = vpop.eup %774  ;;  %v562_v24 = vsub.f32 %v1020_v25, %v540_v62 }
 0x279   :  { %v777_v0 = vpop.eup %776  ;;  %v575_v1 = vsel %vm392_vm0, %v559_v18, 0.0  ;;  %v530_v2 = vmul.f32 0.6931472, %v775_v63 }
 0x27a   :  { %v520_v3 = vpop.xlane.xlu1 %519  ;;  %591 = vst [vmem:[#allocation9 + $0x30] sm:$0xff] %v575_v1  ;;  %v578_v4 = vsel %vm392_vm0, %v562_v24, 0.0  ;;  %v536_v7 = vmul.f32 0.6931472, %v777_v0 }
 0x27b   :  { %786 = vlog2.f32 %v520_v3  ;;  %594 = vst [vmem:[#allocation9 + $0x48] sm:$0xff] %v578_v4  ;;  %v557_v8 = vsub.f32 %v1029_v38, %v530_v2 }
 0x27c   :  { %v779_v30 = vpop.eup %778  ;;  %v560_v9 = vsub.f32 %v1026_v32, %v536_v7 }
 0x27d   :  { %v781_v10 = vpop.eup %780  ;;  %v573_v25 = vsel %vm392_vm0, %v557_v8, 0.0  ;;  %v546_v13 = vmul.f32 0.6931472, %v779_v30 }
 0x27e   :  { %589 = vst [vmem:[#allocation9 + $0x20] sm:$0xff] %v573_v25  ;;  %v576_v14 = vsel %vm392_vm0, %v560_v9, 0.0  ;;  %v532_v15 = vmul.f32 0.6931472, %v781_v10 }
 0x27f   :  { %592 = vst [vmem:[#allocation9 + $0x38] sm:$0xff] %v576_v14  ;;  %v565_v16 = vsub.f32 %v1036_v46, %v546_v13 }
 0x280   :  { %v783_v20 = vpop.eup %782  ;;  %v558_v21 = vsub.f32 %v1032_v40, %v532_v15 }
 0x281   :  { %v785_v38 = vpop.eup %784  ;;  %v581_v32 = vsel %vm392_vm0, %v565_v16, 0.0  ;;  %v550_v22 = vmul.f32 0.6931472, %v783_v20 }
 0x282   :  { %597 = vst [vmem:[#allocation9 + $0x60] sm:$0xff] %v581_v32  ;;  %v574_v23 = vsel %vm392_vm0, %v558_v21, 0.0  ;;  %v548_v26 = vmul.f32 0.6931472, %v785_v38 }
 0x283   :  { %590 = vst [vmem:[#allocation9 + $0x28] sm:$0xff] %v574_v23  ;;  %v567_v27 = vsub.f32 %v1044_v54, %v550_v22 }
 0x284   :  { %v566_v29 = vsub.f32 %v1040_v48, %v548_v26 }
 0x285   :  { %v787_v28 = vpop.eup %786  ;;  %v583_v46 = vsel %vm392_vm0, %v567_v27, 0.0 }
 0x286   :  { %v552_v40 = vmul.f32 0.6931472, %v787_v28  ;;  %599 = vst [vmem:[#allocation9 + $0x70] sm:$0xff] %v583_v46  ;;  %v582_v31 = vsel %vm392_vm0, %v566_v29, 0.0 }
 0x287   :  { %598 = vst [vmem:[#allocation9 + $0x68] sm:$0xff] %v582_v31 }
 0x288   :  { %v568_v33 = vsub.f32 %v1048_v56, %v552_v40 }
 0x28a   :  { %v584_v54 = vsel %vm392_vm0, %v568_v33, 0.0 }
 0x28b   :  { %600 = vst [vmem:[#allocation9 + $0x78] sm:$0xff] %v584_v54 }
 0x28c   :  { %865 = shalt.err (!%p862_p0)
}
 0x28d   :  { %s866_s26 = scalar_lea.hbm %s1115_s3, 2048 }
 0x28e   :  { %p867_p1 = scmp.ne.s32.totalorder %s1115_s3, %s866_s26  ;;  %p870_p2 = scmp.lt.u32.totalorder %s866_s26, %s1115_s3 }
 0x290   :  { %p872_p3 = pnand %p870_p2, %p867_p1 }
 0x292   :  { %875 = shalt.err (!%p872_p3)
}
 0x293   :  { %s888_s4 = smov 128   ;;  %s889_s5 = smov 8  }
 0x294   :  { %612 = dma.vmem_to_hbm [thread:$0]  %s607_s22, 2048, %s1115_s3, [#allocation5], %s888_s4, %s888_s4, %s889_s5  }
 0x295   :  { %880 = dma.done.wait [#allocation5], 2048  }
 0x296   :  { %881 = vsyncadd [#allocation5], 4294965248 }
 0x297   :  { %616 = vsyncpa [#allocation4], 1 }
 0x298   :  { %617 = vsyncpa [#allocation7], 1 }
 0x299   :  { %618 = vsyncpa [#allocation5], 1 }

</bundles_post_ra>
